<compile_context>
chip_gen: v5e
topology: v5e:2x2
jax: 0.10.0
libtpu: 0.0.40
codegen_flags: <defaults>
</compile_context>

<pallas_src>
import functools

import jax
import jax.numpy as jnp
from jax.experimental import pallas as pl
from jax.experimental.pallas import tpu as pltpu

LN_EPS = 1e-5
LANE = 128


def _cdiv(a, b):
    return -(-a // b)


def _round_up(x, m):
    return _cdiv(x, m) * m


def _masked_layernorm(x, gamma, beta, true_dim):
    """LayerNorm over the last dim, ignoring zero-padded lanes.

    Assumes padded lanes of `x` are exactly zero and gamma/beta are zero
    there, so padded lanes stay zero on output.  Sum and sum-of-squares are
    issued together; var is clamped at 0 to guard f32 cancellation."""
    inv_n = 1.0 / float(true_dim)
    s = jnp.sum(x, axis=-1, keepdims=True)
    sq = jnp.sum(x * x, axis=-1, keepdims=True)
    mean = s * inv_n
    var = jnp.maximum(sq * inv_n - mean * mean, 0.0)
    inv = jax.lax.rsqrt(var + LN_EPS)
    return (x - mean) * inv * gamma + beta


def critic_kernel(xa_ref,
                  wf_ref, b1_ref, g1_ref, be1_ref,
                  w2a_ref, b2_ref, g2_ref, be2_ref,
                  wv_ref, bv_ref,
                  out_ref, *, h1p, true_h1, true_h2):
    xa = xa_ref[...]                                  # (tm, ni+na) bf16

    # Fused block-diagonal matmul: [x@w1 | a@w2b] in one MXU pass, f32 acc.
    fused = jnp.dot(xa, wf_ref[...], preferred_element_type=jnp.float32)
    h1 = fused[:, :h1p] + b1_ref[...]                 # 128-aligned slice
    aw2b = fused[:, h1p:]

    # LayerNorm (f32, masked to true width) + ReLU, then bf16 for the MXU.
    h1 = _masked_layernorm(h1, g1_ref[...], be1_ref[...], true_h1)
    h1 = jnp.maximum(h1, 0.0).astype(jnp.bfloat16)

    # fc2 over concat([h1, actions]) == h1 @ w2a + a @ w2b (already computed)
    h2 = (jnp.dot(h1, w2a_ref[...], preferred_element_type=jnp.float32)
          + aw2b + b2_ref[...])
    h2 = _masked_layernorm(h2, g2_ref[...], be2_ref[...], true_h2)
    h2 = jnp.maximum(h2, 0.0).astype(jnp.bfloat16)

    # Value head on the MXU: (h2p, 128) weight with real column 0.
    v = jnp.dot(h2, wv_ref[...], preferred_element_type=jnp.float32)
    v = v + bv_ref[0, 0]                              # scalar from SMEM

    # Lane-dense, unmasked bf16 store; wrapper keeps column 0 only.
    out_ref[...] = v.astype(out_ref.dtype)


@functools.partial(jax.jit, static_argnames=("true_dims", "block_m"))
def critic_forward(inputs, actions, kparams, *, true_dims, block_m=1024):
    h1, h2, h1p, h2p = true_dims
    B = inputs.shape[0]
    feat = inputs.shape[1] + actions.shape[1]

    # Concatenate + pre-cast to bf16 (matmul operands are bf16 anyway with
    # f32 MXU accumulation) -> halves activation DMA.
    xa = jnp.concatenate([inputs, actions], axis=1).astype(jnp.bfloat16)

    # Balanced batch tiles, multiple of 16 sublanes (bf16 packing).  Large
    # tiles amortize the ~0.35us per-grid-step overhead; keep >= 2 (even)
    # tiles once the batch is big enough so megacore (v7x) can shard the
    # "parallel" axis.
    b16 = _round_up(B, 16)
    num_tiles = _cdiv(b16, block_m)
    if b16 >= 512:
        num_tiles = max(num_tiles, 2)
    if num_tiles > 1 and num_tiles % 2:
        num_tiles += 1
    tm = _round_up(_cdiv(b16, num_tiles), 16)
    bp = tm * num_tiles
    if bp != B:
        xa = jnp.pad(xa, ((0, bp - B), (0, 0)))

    kernel = functools.partial(critic_kernel, h1p=h1p, true_h1=h1, true_h2=h2)

    def const_spec(arr):
        # constant index_map -> block stays VMEM-resident across grid steps
        return pl.BlockSpec(arr.shape, lambda i: (0, 0))

    args = (xa,
            kparams["wf"], kparams["b1"], kparams["g1"], kparams["be1"],
            kparams["w2a"], kparams["b2"], kparams["g2"], kparams["be2"],
            kparams["wv"], kparams["bv"])

    in_specs = [pl.BlockSpec((tm, feat), lambda i: (i, 0))]       # streamed
    in_specs += [const_spec(a) for a in args[1:-1]]               # resident
    in_specs += [pl.BlockSpec(memory_space=pltpu.MemorySpace.SMEM)]  # bv

    out = pl.pallas_call(
        kernel,
        grid=(num_tiles,),
        in_specs=in_specs,
        out_specs=pl.BlockSpec((tm, LANE), lambda i: (i, 0)),
        out_shape=jax.ShapeDtypeStruct((bp, LANE), jnp.bfloat16),
        compiler_params=pltpu.CompilerParams(
            dimension_semantics=("parallel",),
            vmem_limit_bytes=32 * 1024 * 1024),
    )(*args)

    return out[:B, :1].astype(jnp.float32)


def init_critic_params(key, num_inputs, num_actions,
                       hidden_sizes=(400, 300), uniform_init=(0.003, 0.0003)):
    """Unpadded f32 parameters (weights stored [in, out])."""
    h1, h2 = hidden_sizes
    ks = jax.random.split(key, 6)

    def unif(k, shape, bound):
        return jax.random.uniform(k, shape, jnp.float32, -bound, bound)

    w1_bound = 1.0 / (num_inputs ** 0.5)            # fanin_init(fc1.weight)
    b1_bound = 1.0 / (h1 ** 0.5)                    # fanin_init(fc1.bias)
    w2_bound = 1.0 / ((h1 + num_actions) ** 0.5)    # fanin_init(fc2.weight)
    b2_bound = 1.0 / (h2 ** 0.5)                    # fanin_init(fc2.bias)

    w2_full = unif(ks[2], (h1 + num_actions, h2), w2_bound)
    return {
        "w1": unif(ks[0], (num_inputs, h1), w1_bound),
        "b1": unif(ks[1], (1, h1), b1_bound),
        "g1": jnp.ones((1, h1), jnp.float32),
        "be1": jnp.zeros((1, h1), jnp.float32),
        "w2a": w2_full[:h1, :],
        "w2b": w2_full[h1:, :],
        "b2": unif(ks[3], (1, h2), b2_bound),
        "g2": jnp.ones((1, h2), jnp.float32),
        "be2": jnp.zeros((1, h2), jnp.float32),
        "wv": unif(ks[4], (h2, 1), uniform_init[0]),
        "bv": unif(ks[5], (1, 1), uniform_init[1]),
    }


def pack_kernel_params(params, lane=LANE):
    """Pad hidden dims to lane-aligned sizes; bf16 MXU weights, f32 LN params.

    LOAD-BEARING INVARIANT: every padded lane of every weight / bias / gamma /
    beta below is ZERO (jnp.pad / jnp.zeros).  That keeps padded pre-LN
    activations exactly zero, so the masked LayerNorm statistics (divided by
    the true widths) are exact and padded lanes stay zero through ReLU and
    the following matmuls.  Do NOT initialize padded gamma lanes to 1."""
    num_inputs = params["w1"].shape[0]
    num_actions = params["w2b"].shape[0]
    h1 = params["w1"].shape[1]
    h2 = params["w2a"].shape[1]
    h1p = _round_up(h1, lane)   # 400 -> 512
    h2p = _round_up(h2, lane)   # 300 -> 384

    def pad_to(x, rows, cols):
        return jnp.pad(x, ((0, rows - x.shape[0]), (0, cols - x.shape[1])))

    # Block-diagonal fused weight [[w1, 0], [0, w2b]] for the single first
    # MXU pass over concat([inputs, actions]).
    wf = jnp.zeros((num_inputs + num_actions, h1p + h2p), jnp.float32)
    wf = wf.at[:num_inputs, :h1].set(params["w1"])
    wf = wf.at[num_inputs:, h1p:h1p + h2].set(params["w2b"])

    kp = {
        "wf": wf.astype(jnp.bfloat16),
        "w2a": pad_to(params["w2a"], h1p, h2p).astype(jnp.bfloat16),
        # bias / LayerNorm params in f32; padded lanes are zero.
        "b1": pad_to(params["b1"], 1, h1p),
        "g1": pad_to(params["g1"], 1, h1p),
        "be1": pad_to(params["be1"], 1, h1p),
        "b2": pad_to(params["b2"], 1, h2p),
        "g2": pad_to(params["g2"], 1, h2p),
        "be2": pad_to(params["be2"], 1, h2p),
        # value head on the MXU: (h2p, 128) bf16, real weights in column 0.
        "wv": pad_to(params["wv"], h2p, lane).astype(jnp.bfloat16),
        # scalar bias -> SMEM
        "bv": params["bv"],
    }
    return kp, (h1, h2, h1p, h2p)


def _layernorm_ref(x, gamma, beta):
    mean = jnp.mean(x, axis=-1, keepdims=True)
    c = x - mean
    var = jnp.mean(c * c, axis=-1, keepdims=True)
    return c * jax.lax.rsqrt(var + LN_EPS) * gamma + beta


def critic_reference(inputs, actions, params):
    # Pure-JAX f32 reference of the same forward pass.
    h1 = inputs @ params["w1"] + params["b1"]
    h1 = jax.nn.relu(_layernorm_ref(h1, params["g1"], params["be1"]))
    h2 = h1 @ params["w2a"] + actions @ params["w2b"] + params["b2"]
    h2 = jax.nn.relu(_layernorm_ref(h2, params["g2"], params["be2"]))
    return h2 @ params["wv"] + params["bv"]


if __name__ == "__main__":
    B, NUM_INPUTS, NUM_ACTIONS = 8, 32, 8

    key = jax.random.PRNGKey(0)
    k_params, k_x, k_a = jax.random.split(key, 3)

    params = init_critic_params(k_params, NUM_INPUTS, NUM_ACTIONS)
    kparams, true_dims = pack_kernel_params(params)

    inputs = jax.random.normal(k_x, (B, NUM_INPUTS), jnp.float32)
    actions = jax.random.normal(k_a, (B, NUM_ACTIONS), jnp.float32)

    out = critic_forward(inputs, actions, kparams, true_dims=true_dims)
    jax.block_until_ready(out)

    ref = critic_reference(inputs, actions, params)
    assert out.shape == (B, 1)
    # bf16 matmul operands + bf16 output store -> relaxed tolerance vs. f32 ref
    err = float(jnp.max(jnp.abs(out - ref)))
    assert jnp.allclose(out, ref, atol=1e-2, rtol=1e-2), err

    print("KERNEL_OK")
</pallas_src>

<mosaic_0001>
module attributes {stable_mosaic.version = 11 : i64} {
  func.func @critic_kernel(%arg0: i32, %arg1: memref<16x40xbf16, #tpu.memory_space<vmem>>, %arg2: memref<40x896xbf16, #tpu.memory_space<vmem>>, %arg3: memref<1x512xf32, #tpu.memory_space<vmem>>, %arg4: memref<1x512xf32, #tpu.memory_space<vmem>>, %arg5: memref<1x512xf32, #tpu.memory_space<vmem>>, %arg6: memref<512x384xbf16, #tpu.memory_space<vmem>>, %arg7: memref<1x384xf32, #tpu.memory_space<vmem>>, %arg8: memref<1x384xf32, #tpu.memory_space<vmem>>, %arg9: memref<1x384xf32, #tpu.memory_space<vmem>>, %arg10: memref<384x128xbf16, #tpu.memory_space<vmem>>, %arg11: memref<1x1xf32, #tpu.memory_space<smem>>, %arg12: memref<16x128xbf16, #tpu.memory_space<vmem>>) attributes {dimension_semantics = [#tpu.dimension_semantics<parallel>], iteration_bounds = array<i64: 1>, scalar_prefetch = 0 : i64, scratch_operands = 0 : i64, tpu.core_type = #tpu.core_type<tc>, window_params = [{transform_indices = @transform_0, window_bounds = array<i64: 16, 40>}, {pipeline_mode = #tpu.pipeline_mode<synchronous>, transform_indices = @transform_1, window_bounds = array<i64: 40, 896>}, {pipeline_mode = #tpu.pipeline_mode<synchronous>, transform_indices = @transform_2, window_bounds = array<i64: 1, 512>}, {pipeline_mode = #tpu.pipeline_mode<synchronous>, transform_indices = @transform_3, window_bounds = array<i64: 1, 512>}, {pipeline_mode = #tpu.pipeline_mode<synchronous>, transform_indices = @transform_4, window_bounds = array<i64: 1, 512>}, {pipeline_mode = #tpu.pipeline_mode<synchronous>, transform_indices = @transform_5, window_bounds = array<i64: 512, 384>}, {pipeline_mode = #tpu.pipeline_mode<synchronous>, transform_indices = @transform_6, window_bounds = array<i64: 1, 384>}, {pipeline_mode = #tpu.pipeline_mode<synchronous>, transform_indices = @transform_7, window_bounds = array<i64: 1, 384>}, {pipeline_mode = #tpu.pipeline_mode<synchronous>, transform_indices = @transform_8, window_bounds = array<i64: 1, 384>}, {pipeline_mode = #tpu.pipeline_mode<synchronous>, transform_indices = @transform_9, window_bounds = array<i64: 384, 128>}, {transform_indices = @transform_10, window_bounds = array<i64: 1, 1>}, {transform_indices = @transform_11, window_bounds = array<i64: 16, 128>}]} {
    %c0 = arith.constant 0 : index
    %c0_0 = arith.constant 0 : index
    %0 = vector.load %arg1[%c0, %c0_0] : memref<16x40xbf16, #tpu.memory_space<vmem>>, vector<16x40xbf16>
    %c0_1 = arith.constant 0 : index
    %c0_2 = arith.constant 0 : index
    %1 = vector.load %arg2[%c0_1, %c0_2] : memref<40x896xbf16, #tpu.memory_space<vmem>>, vector<40x896xbf16>
    %cst = arith.constant dense<0.000000e+00> : vector<16x896xf32>
    %2 = tpu.matmul %0, %1, %cst {dimension_numbers = #tpu.dot_dimension_numbers<[1], [0], [0], [1], [0, 0, 1, 1], [], []>} : vector<16x40xbf16>, vector<40x896xbf16>, vector<16x896xf32> -> vector<16x896xf32>
    %3 = vector.extract_strided_slice %2 {offsets = [0, 0], sizes = [16, 512], strides = [1, 1]} : vector<16x896xf32> to vector<16x512xf32>
    %c0_3 = arith.constant 0 : index
    %c0_4 = arith.constant 0 : index
    %4 = vector.load %arg3[%c0_3, %c0_4] : memref<1x512xf32, #tpu.memory_space<vmem>>, vector<1x512xf32>
    %5 = vector.broadcast %4 : vector<1x512xf32> to vector<16x512xf32>
    %6 = arith.addf %3, %5 : vector<16x512xf32>
    %7 = vector.extract_strided_slice %2 {offsets = [0, 512], sizes = [16, 384], strides = [1, 1]} : vector<16x896xf32> to vector<16x384xf32>
    %c0_5 = arith.constant 0 : index
    %c0_6 = arith.constant 0 : index
    %8 = vector.load %arg4[%c0_5, %c0_6] : memref<1x512xf32, #tpu.memory_space<vmem>>, vector<1x512xf32>
    %c0_7 = arith.constant 0 : index
    %c0_8 = arith.constant 0 : index
    %9 = vector.load %arg5[%c0_7, %c0_8] : memref<1x512xf32, #tpu.memory_space<vmem>>, vector<1x512xf32>
    %cst_9 = arith.constant dense<0.000000e+00> : vector<16xf32>
    %10 = vector.multi_reduction <add>, %6, %cst_9 [1] : vector<16x512xf32> to vector<16xf32>
    %11 = vector.shape_cast %10 : vector<16xf32> to vector<16x1xf32>
    %12 = arith.mulf %6, %6 : vector<16x512xf32>
    %cst_10 = arith.constant dense<0.000000e+00> : vector<16xf32>
    %13 = vector.multi_reduction <add>, %12, %cst_10 [1] : vector<16x512xf32> to vector<16xf32>
    %14 = vector.shape_cast %13 : vector<16xf32> to vector<16x1xf32>
    %cst_11 = arith.constant 2.500000e-03 : f32
    %15 = vector.broadcast %cst_11 : f32 to vector<16x1xf32>
    %16 = arith.mulf %11, %15 : vector<16x1xf32>
    %cst_12 = arith.constant 2.500000e-03 : f32
    %17 = vector.broadcast %cst_12 : f32 to vector<16x1xf32>
    %18 = arith.mulf %14, %17 : vector<16x1xf32>
    %19 = arith.mulf %16, %16 : vector<16x1xf32>
    %20 = arith.subf %18, %19 : vector<16x1xf32>
    %cst_13 = arith.constant 0.000000e+00 : f32
    %21 = vector.broadcast %cst_13 : f32 to vector<16x1xf32>
    %22 = arith.maximumf %20, %21 : vector<16x1xf32>
    %cst_14 = arith.constant 9.99999974E-6 : f32
    %23 = vector.broadcast %cst_14 : f32 to vector<16x1xf32>
    %24 = arith.addf %22, %23 : vector<16x1xf32>
    %25 = math.rsqrt %24 : vector<16x1xf32>
    %26 = vector.broadcast %16 : vector<16x1xf32> to vector<16x512xf32>
    %27 = arith.subf %6, %26 : vector<16x512xf32>
    %28 = vector.broadcast %25 : vector<16x1xf32> to vector<16x512xf32>
    %29 = arith.mulf %27, %28 : vector<16x512xf32>
    %30 = vector.broadcast %8 : vector<1x512xf32> to vector<16x512xf32>
    %31 = arith.mulf %29, %30 : vector<16x512xf32>
    %32 = vector.broadcast %9 : vector<1x512xf32> to vector<16x512xf32>
    %33 = arith.addf %31, %32 : vector<16x512xf32>
    %cst_15 = arith.constant 0.000000e+00 : f32
    %34 = vector.broadcast %cst_15 : f32 to vector<16x512xf32>
    %35 = arith.maximumf %33, %34 : vector<16x512xf32>
    %36 = arith.truncf %35 : vector<16x512xf32> to vector<16x512xbf16>
    %c0_16 = arith.constant 0 : index
    %c0_17 = arith.constant 0 : index
    %37 = vector.load %arg6[%c0_16, %c0_17] : memref<512x384xbf16, #tpu.memory_space<vmem>>, vector<512x384xbf16>
    %cst_18 = arith.constant dense<0.000000e+00> : vector<16x384xf32>
    %38 = tpu.matmul %36, %37, %cst_18 {dimension_numbers = #tpu.dot_dimension_numbers<[1], [0], [0], [1], [0, 0, 1, 1], [], []>} : vector<16x512xbf16>, vector<512x384xbf16>, vector<16x384xf32> -> vector<16x384xf32>
    %39 = arith.addf %38, %7 : vector<16x384xf32>
    %c0_19 = arith.constant 0 : index
    %c0_20 = arith.constant 0 : index
    %40 = vector.load %arg7[%c0_19, %c0_20] : memref<1x384xf32, #tpu.memory_space<vmem>>, vector<1x384xf32>
    %41 = vector.broadcast %40 : vector<1x384xf32> to vector<16x384xf32>
    %42 = arith.addf %39, %41 : vector<16x384xf32>
    %c0_21 = arith.constant 0 : index
    %c0_22 = arith.constant 0 : index
    %43 = vector.load %arg8[%c0_21, %c0_22] : memref<1x384xf32, #tpu.memory_space<vmem>>, vector<1x384xf32>
    %c0_23 = arith.constant 0 : index
    %c0_24 = arith.constant 0 : index
    %44 = vector.load %arg9[%c0_23, %c0_24] : memref<1x384xf32, #tpu.memory_space<vmem>>, vector<1x384xf32>
    %cst_25 = arith.constant dense<0.000000e+00> : vector<16xf32>
    %45 = vector.multi_reduction <add>, %42, %cst_25 [1] : vector<16x384xf32> to vector<16xf32>
    %46 = vector.shape_cast %45 : vector<16xf32> to vector<16x1xf32>
    %47 = arith.mulf %42, %42 : vector<16x384xf32>
    %cst_26 = arith.constant dense<0.000000e+00> : vector<16xf32>
    %48 = vector.multi_reduction <add>, %47, %cst_26 [1] : vector<16x384xf32> to vector<16xf32>
    %49 = vector.shape_cast %48 : vector<16xf32> to vector<16x1xf32>
    %cst_27 = arith.constant 0.00333333341 : f32
    %50 = vector.broadcast %cst_27 : f32 to vector<16x1xf32>
    %51 = arith.mulf %46, %50 : vector<16x1xf32>
    %cst_28 = arith.constant 0.00333333341 : f32
    %52 = vector.broadcast %cst_28 : f32 to vector<16x1xf32>
    %53 = arith.mulf %49, %52 : vector<16x1xf32>
    %54 = arith.mulf %51, %51 : vector<16x1xf32>
    %55 = arith.subf %53, %54 : vector<16x1xf32>
    %cst_29 = arith.constant 0.000000e+00 : f32
    %56 = vector.broadcast %cst_29 : f32 to vector<16x1xf32>
    %57 = arith.maximumf %55, %56 : vector<16x1xf32>
    %cst_30 = arith.constant 9.99999974E-6 : f32
    %58 = vector.broadcast %cst_30 : f32 to vector<16x1xf32>
    %59 = arith.addf %57, %58 : vector<16x1xf32>
    %60 = math.rsqrt %59 : vector<16x1xf32>
    %61 = vector.broadcast %51 : vector<16x1xf32> to vector<16x384xf32>
    %62 = arith.subf %42, %61 : vector<16x384xf32>
    %63 = vector.broadcast %60 : vector<16x1xf32> to vector<16x384xf32>
    %64 = arith.mulf %62, %63 : vector<16x384xf32>
    %65 = vector.broadcast %43 : vector<1x384xf32> to vector<16x384xf32>
    %66 = arith.mulf %64, %65 : vector<16x384xf32>
    %67 = vector.broadcast %44 : vector<1x384xf32> to vector<16x384xf32>
    %68 = arith.addf %66, %67 : vector<16x384xf32>
    %cst_31 = arith.constant 0.000000e+00 : f32
    %69 = vector.broadcast %cst_31 : f32 to vector<16x384xf32>
    %70 = arith.maximumf %68, %69 : vector<16x384xf32>
    %71 = arith.truncf %70 : vector<16x384xf32> to vector<16x384xbf16>
    %c0_32 = arith.constant 0 : index
    %c0_33 = arith.constant 0 : index
    %72 = vector.load %arg10[%c0_32, %c0_33] : memref<384x128xbf16, #tpu.memory_space<vmem>>, vector<384x128xbf16>
    %cst_34 = arith.constant dense<0.000000e+00> : vector<16x128xf32>
    %73 = tpu.matmul %71, %72, %cst_34 {dimension_numbers = #tpu.dot_dimension_numbers<[1], [0], [0], [1], [0, 0, 1, 1], [], []>} : vector<16x384xbf16>, vector<384x128xbf16>, vector<16x128xf32> -> vector<16x128xf32>
    %c0_35 = arith.constant 0 : index
    %c0_36 = arith.constant 0 : index
    %74 = memref.load %arg11[%c0_35, %c0_36] : memref<1x1xf32, #tpu.memory_space<smem>>
    %75 = vector.broadcast %74 : f32 to vector<16x128xf32>
    %76 = arith.addf %73, %75 : vector<16x128xf32>
    %77 = arith.truncf %76 : vector<16x128xf32> to vector<16x128xbf16>
    %c0_37 = arith.constant 0 : index
    %c0_38 = arith.constant 0 : index
    %78 = vector.load %arg12[%c0_37, %c0_38] : memref<16x128xbf16, #tpu.memory_space<vmem>>, vector<16x128xbf16>
    tpu.vector_store %arg12[%c0_37, %c0_38], %77 {strides = array<i32>} : memref<16x128xbf16, #tpu.memory_space<vmem>>, vector<16x128xbf16>,
    return
  }
  func.func @transform_0(%arg0: i32) -> (i32, i32) {
    %c0_i32 = arith.constant 0 : i32
    %c0_i32_0 = arith.constant 0 : i32
    return %arg0, %c0_i32 : i32, i32
  }
  func.func @transform_1(%arg0: i32) -> (i32, i32) {
    %c0_i32 = arith.constant 0 : i32
    %c0_i32_0 = arith.constant 0 : i32
    %c0_i32_1 = arith.constant 0 : i32
    return %c0_i32, %c0_i32_0 : i32, i32
  }
  func.func @transform_2(%arg0: i32) -> (i32, i32) {
    %c0_i32 = arith.constant 0 : i32
    %c0_i32_0 = arith.constant 0 : i32
    %c0_i32_1 = arith.constant 0 : i32
    return %c0_i32, %c0_i32_0 : i32, i32
  }
  func.func @transform_3(%arg0: i32) -> (i32, i32) {
    %c0_i32 = arith.constant 0 : i32
    %c0_i32_0 = arith.constant 0 : i32
    %c0_i32_1 = arith.constant 0 : i32
    return %c0_i32, %c0_i32_0 : i32, i32
  }
  func.func @transform_4(%arg0: i32) -> (i32, i32) {
    %c0_i32 = arith.constant 0 : i32
    %c0_i32_0 = arith.constant 0 : i32
    %c0_i32_1 = arith.constant 0 : i32
    return %c0_i32, %c0_i32_0 : i32, i32
  }
  func.func @transform_5(%arg0: i32) -> (i32, i32) {
    %c0_i32 = arith.constant 0 : i32
    %c0_i32_0 = arith.constant 0 : i32
    %c0_i32_1 = arith.constant 0 : i32
    return %c0_i32, %c0_i32_0 : i32, i32
  }
  func.func @transform_6(%arg0: i32) -> (i32, i32) {
    %c0_i32 = arith.constant 0 : i32
    %c0_i32_0 = arith.constant 0 : i32
    %c0_i32_1 = arith.constant 0 : i32
    return %c0_i32, %c0_i32_0 : i32, i32
  }
  func.func @transform_7(%arg0: i32) -> (i32, i32) {
    %c0_i32 = arith.constant 0 : i32
    %c0_i32_0 = arith.constant 0 : i32
    %c0_i32_1 = arith.constant 0 : i32
    return %c0_i32, %c0_i32_0 : i32, i32
  }
  func.func @transform_8(%arg0: i32) -> (i32, i32) {
    %c0_i32 = arith.constant 0 : i32
    %c0_i32_0 = arith.constant 0 : i32
    %c0_i32_1 = arith.constant 0 : i32
    return %c0_i32, %c0_i32_0 : i32, i32
  }
  func.func @transform_9(%arg0: i32) -> (i32, i32) {
    %c0_i32 = arith.constant 0 : i32
    %c0_i32_0 = arith.constant 0 : i32
    %c0_i32_1 = arith.constant 0 : i32
    return %c0_i32, %c0_i32_0 : i32, i32
  }
  func.func @transform_10(%arg0: i32) -> (i32, i32) {
    %c0_i32 = arith.constant 0 : i32
    %c0_i32_0 = arith.constant 0 : i32
    %c0_i32_1 = arith.constant 0 : i32
    return %c0_i32, %c0_i32_0 : i32, i32
  }
  func.func @transform_11(%arg0: i32) -> (i32, i32) {
    %c0_i32 = arith.constant 0 : i32
    %c0_i32_0 = arith.constant 0 : i32
    return %arg0, %c0_i32 : i32, i32
  }
}

</mosaic_0001>

<bundles_post_ra>
// kernel: critic_forward.1
= control target key start
LH: loop header
LB: loop body
LE: loop exit
PB: predicated region body
PF: predicated region fallthrough
CT: control target
= control target key end

     0   :  { %17 = vsyncpa [#allocation4], 0  ;;  %s2694_s0 = inlined_call_operand.vmem [shape: bf16[16,40], index: 0, kind: input, shape index: {}]   ;;  %s2695_s1 = inlined_call_operand.hbm [shape: bf16[40,896], index: 1, kind: input, shape index: {}]   ;;  %s2696_s2 = inlined_call_operand.vmem [shape: f32[1,512], index: 2, kind: input, shape index: {}]   ;;  %s2697_s3 = inlined_call_operand.vmem [shape: f32[1,512], index: 3, kind: input, shape index: {}]   ;;  %s2698_s4 = inlined_call_operand.vmem [shape: f32[1,512], index: 4, kind: input, shape index: {}]   ;;  %s2699_s5 = inlined_call_operand.hbm [shape: bf16[512,384], index: 5, kind: input, shape index: {}]   ;;  %s2700_s6 = inlined_call_operand.vmem [shape: f32[1,384], index: 6, kind: input, shape index: {}]   ;;  %s2701_s7 = inlined_call_operand.vmem [shape: f32[1,384], index: 7, kind: input, shape index: {}]   ;;  %s2702_s8 = inlined_call_operand.vmem [shape: f32[1,384], index: 8, kind: input, shape index: {}]   ;;  %s2703_s9 = inlined_call_operand.hbm [shape: bf16[384,128], index: 9, kind: input, shape index: {}]   ;;  %s2704_s10 = inlined_call_operand.<no memory space> [shape: f32[1,1], index: 10, kind: input, shape index: {}]   ;;  %s2705_s11 = inlined_call_operand.vmem [shape: bf16[16,128], index: 11, kind: output, shape index: {}]  }
   0x1   :  { %18 = vsyncpa [#allocation6], 0  ;;  %s44_s19 = sshll.u32 %s2699_s5, 4  ;;  %s2421_s20 = smov [#allocation5]   ;;  %s45_s19 = int_to_ptr.hbm [resolvable:$true] %s44_s19 }
   0x2   :  { %s46_s21 = sshll.u32 %s2421_s20, 4  ;;  %s25_s24 = sshll.u32 %s2695_s1, 4  ;;  %s47_s21 = int_to_ptr.vmem [resolvable:$true] %s46_s21  ;;  %s26_s24 = int_to_ptr.hbm [resolvable:$true] %s25_s24 }
   0x3   :  { %s2422_s25 = smov 192   ;;  %s2423_s26 = smov 12  }
   0x4   :  { %52 = dma.hbm_to_vmem [thread:$0]  %s45_s19, 12288, %s47_s21, [#allocation6], %s2422_s25, %s2422_s25, %s2423_s26  }
   0x5   :  { %s2424_s27 = smov [#allocation3]   ;;  %s2425_s29 = smov 448  }
   0x6   :  { %s27_s28 = sshll.u32 %s2424_s27, 4  ;;  %s2426_s30 = smov 28   ;;  %s28_s28 = int_to_ptr.vmem [resolvable:$true] %s27_s28 }
   0x7   :  { %33 = dma.hbm_to_vmem [thread:$0]  %s26_s24, 2240, %s28_s28, [#allocation4], %s2425_s29, %s2425_s29, %s2426_s30  }
   0x8   :  { %s63_s13 = sshll.u32 %s2703_s9, 4  ;;  %s2427_s14 = smov [#allocation7]   ;;  %s64_s13 = int_to_ptr.hbm [resolvable:$true] %s63_s13 }
   0x9   :  { %s65_s15 = sshll.u32 %s2427_s14, 4  ;;  %s2428_s16 = smov 64   ;;  %s66_s15 = int_to_ptr.vmem [resolvable:$true] %s65_s15 }
   0xa   :  { %s2429_s1 = smov 4  }
   0xb   :  { %71 = dma.hbm_to_vmem [thread:$0]  %s64_s13, 3072, %s66_s15, [#allocation6], %s2428_s16, %s2428_s16, %s2429_s1  }
   0xc   :  { %2417 = dma.done.wait [#allocation4], 2240  }
   0xd   :  { %2418 = vsyncadd [#allocation4], 4294965056 }
   0xe   :  { %2419 = dma.done.wait [#allocation6], 15360  }
   0xf   :  { %2420 = vsyncadd [#allocation6], 4294951936  ;;  %v105_v0 = vld [vmem:[#allocation3 + $0x70] sm:$0xff]  ;;  %vm208_vm0 = vcmask 1043456   ;;  %v1675_v3 = vld [vmem:[#allocation3 + $0x38] sm:$0xf] }
  0x10   :  { %v162_v1 = vunpack.c.l.b16 %v105_v0  ;;  %v163_v2 = vunpack.c.h.b16 %v105_v0  ;;  %v106_v4 = vld [vmem:[#allocation3 + $0x78] sm:$0xff]  ;;  %v2199_v6 = vld [vmem:[#allocation3 + $0x50] sm:$0xf0]  ;;  %v2197_v15 = vld [vmem:[#allocation3 + $0x44] sm:$0xf]  ;;  %vm204_vm1 = vcmask 326656  }
  0x11   :  { %v2196_v8 = vld [vmem:[#allocation3 + $0x3c] sm:$0xf]  ;;  %v1677_v9 = vld [vmem:[#allocation3 + $0x54] sm:$0xf0]  ;;  %v165_v10 = vunpack.c.h.b16 %v106_v4  ;;  %v164_v11 = vunpack.c.l.b16 %v106_v4  ;;  %v1685_v16 = vld [vmem:[#allocation3 + $0x5c] sm:$0xf0]  ;;  %v1676_v17 = vor.u32 %v2199_v6, %v1675_v3 }
  0x12   :  { %v183_v5 = vpack.c.b16 %v162_v1, %v162_v1  ;;  %v184_v7 = vpack.c.b16 %v163_v2, %v163_v2  ;;  %v1647_v18 = vld [vmem:[#allocation3] sm:$0xf]  ;;  %v2192_v19 = vld [vmem:[#allocation3 + $0x18] sm:$0xf0]  ;;  %v1680_v20 = vor.u32 %v2196_v8, %v1677_v9  ;;  %v2189_v22 = vld [vmem:[#allocation3 + $0x4] sm:$0xf]  ;;  %v1688_v25 = vor.u32 %v2197_v15, %v1685_v16 }
  0x13   :  { %v186_v14 = vpack.c.b16 %v165_v10, %v165_v10  ;;  %v1649_v23 = vld [vmem:[#allocation3 + $0x1c] sm:$0xf0]  ;;  %v185_v24 = vpack.c.b16 %v164_v11, %v164_v11  ;;  %v2190_v26 = vld [vmem:[#allocation3 + $0xc] sm:$0xf]  ;;  %v1657_v27 = vld [vmem:[#allocation3 + $0x24] sm:$0xf0]  ;;  %v1648_v28 = vor.u32 %v2192_v19, %v1647_v18 }
  0x14   :  { %v210_v12 = vsel %vm208_vm0, %v183_v5, 0  ;;  %v213_v13 = vsel %vm208_vm0, %v184_v7, 0  ;;  %v1652_v29 = vor.u32 %v2189_v22, %v1649_v23  ;;  %v1683_v31 = vld [vmem:[#allocation3 + $0x40] sm:$0xf]  ;;  %v2200_v32 = vld [vmem:[#allocation3 + $0x58] sm:$0xf0]  ;;  %v1660_v33 = vor.u32 %v2190_v26, %v1657_v27 }
  0x15   :  { %235 = vmatpush.bf16.msra.mxu2 %v210_v12  ;;  %249 = vmatpush.bf16.msra.mxu1 %v213_v13  ;;  %v219_v21 = vsel %vm208_vm0, %v186_v14, 0  ;;  %v216_v30 = vsel %vm208_vm0, %v185_v24, 0  ;;  %v2506_v34 = vld [vmem:[%s2694_s0] sm:$0xff]  ;;  %v1684_v35 = vor.u32 %v2200_v32, %v1683_v31  ;;  %v1655_v36 = vld [vmem:[#allocation3 + $0x8] sm:$0xf] }
  0x16   :  { %277 = vmatpush.bf16.msra.mxu3 %v219_v21  ;;  %v2193_v37 = vld [vmem:[#allocation3 + $0x20] sm:$0xf0]  ;;  %v2519_v40 = vld [vmem:[%s2696_s2] sm:$0xf]  ;;  %v108_v42 = vld [vmem:[#allocation3 + $0x88] sm:$0xf] }
  0x17   :  { %v1656_v38 = vor.u32 %v2193_v37, %v1655_v36  ;;  %v107_v41 = vld [vmem:[#allocation3 + $0x80] sm:$0xff]  ;;  %v168_v45 = vunpack.c.l.b16 %v108_v42  ;;  %v330_v46 = vperm.slane %v2519_v40, 0  ;;  %v331_v47 = vperm.slane %v2519_v40, 1  ;;  %v1691_v48 = vld [vmem:[#allocation3 + $0x48] sm:$0xf] }
  0x18   :  { %v166_v43 = vunpack.c.l.b16 %v107_v41  ;;  %v167_v44 = vunpack.c.h.b16 %v107_v41  ;;  %v2201_v52 = vld [vmem:[#allocation3 + $0x60] sm:$0xf0]  ;;  %v2198_v53 = vld [vmem:[#allocation3 + $0x4c] sm:$0xf]  ;;  %v1693_v54 = vld [vmem:[#allocation3 + $0x64] sm:$0xf0] }
  0x19   :  { %236 = vmatpush.bf16.msra.mxu2 %v1676_v17  ;;  %250 = vmatpush.bf16.msra.mxu1 %v1680_v20  ;;  %v189_v51 = vpack.c.b16 %v168_v45, %v168_v45  ;;  %v1699_v56 = vld [vmem:[#allocation3 + $0x50] sm:$0xf]  ;;  %v2202_v57 = vld [vmem:[#allocation3 + $0x68] sm:$0xf0]  ;;  %v1794_v58 = vld [vmem:[#allocation5 + $0xa8] sm:$0xf]  ;;  %v1692_v2 = vor.u32 %v2201_v52, %v1691_v48  ;;  %v1696_v3 = vor.u32 %v2198_v53, %v1693_v54 }
  0x1a   :  { %278 = vmatpush.bf16.msra.mxu3 %v1688_v25  ;;  %v187_v49 = vpack.c.b16 %v166_v43, %v166_v43  ;;  %v188_v50 = vpack.c.b16 %v167_v44, %v167_v44  ;;  %v333_v59 = vperm.slane %v2519_v40, 3  ;;  %v1663_v63 = vld [vmem:[#allocation3 + $0x10] sm:$0xf]  ;;  %v2194_v0 = vld [vmem:[#allocation3 + $0x28] sm:$0xf0]  ;;  %v1700_v8 = vor.u32 %v2202_v57, %v1699_v56 }
  0x1b   :  { %v228_v62 = vsel %vm208_vm0, %v189_v51, 0  ;;  %v2225_v1 = vld [vmem:[#allocation5 + $0xb0] sm:$0xf0]  ;;  %v2191_v4 = vld [vmem:[#allocation3 + $0x14] sm:$0xf]  ;;  %v1664_v22 = vor.u32 %v2194_v0, %v1663_v63  ;;  %v332_v26 = vperm.slane %v2519_v40, 2 }
  0x1c   :  { %v222_v60 = vsel %vm208_vm0, %v187_v49, 0  ;;  %v225_v61 = vsel %vm208_vm0, %v188_v50, 0  ;;  %v1665_v5 = vld [vmem:[#allocation3 + $0x2c] sm:$0xf0]  ;;  %v1671_v6 = vld [vmem:[#allocation3 + $0x18] sm:$0xf]  ;;  %v1795_v10 = vor.u32 %v2225_v1, %v1794_v58 }
  0x1d   :  { %237 = vmatpush.bf16.msra.mxu2 %v1648_v28  ;;  %251 = vmatpush.bf16.msra.mxu1 %v1652_v29  ;;  %v2195_v9 = vld [vmem:[#allocation3 + $0x30] sm:$0xf0]  ;;  %v2249_v12 = vld [vmem:[#allocation5 + $0x170] sm:$0xf0]  ;;  %v1782_v14 = vld [vmem:[#allocation5 + $0x90] sm:$0xf]  ;;  %v1668_v23 = vor.u32 %v2191_v4, %v1665_v5 }
  0x1e   :  { %279 = vmatpush.bf16.msra.mxu3 %v1660_v33  ;;  %291 = vmatpush.bf16.msra.mxu0 %v222_v60  ;;  %v1890_v11 = vld [vmem:[#allocation5 + $0x168] sm:$0xf]  ;;  %v2222_v15 = vld [vmem:[#allocation5 + $0x98] sm:$0xf0]  ;;  %v2273_v18 = vld [vmem:[#allocation5 + $0x230] sm:$0xf0]  ;;  %v1672_v27 = vor.u32 %v2195_v9, %v1671_v6 }
  0x1f   :  { %v1986_v13 = vld [vmem:[#allocation5 + $0x228] sm:$0xf]  ;;  %v2297_v20 = vld [vmem:[#allocation5 + $0x2f0] sm:$0xf0]  ;;  %v1783_v21 = vor.u32 %v2222_v15, %v1782_v14  ;;  %v1770_v24 = vld [vmem:[#allocation5 + $0x78] sm:$0xf]  ;;  %v1891_v28 = vor.u32 %v2249_v12, %v1890_v11 }
  0x20   :  { %1701 = vmatmul.msk.bf16.vlgmr.msra.gmra.mxu2 %vm204_vm1, %v2506_v34  ;;  %1702 = vmatmul.msk.bf16.vlgmr.msra.gmra.mxu1 %vm204_vm1, %v2506_v34  ;;  %v2082_v19 = vld [vmem:[#allocation5 + $0x2e8] sm:$0xf]  ;;  %v2219_v29 = vld [vmem:[#allocation5 + $0x80] sm:$0xf0]  ;;  %v1878_v32 = vld [vmem:[#allocation5 + $0x150] sm:$0xf] }
  0x21   :  { %263 = vmatpush.bf16.msrb.mxu2 %v216_v30  ;;  %1704 = vmatmul.msk.bf16.vlgmr.msra.gmra.mxu3 %vm204_vm1, %v2506_v34  ;;  %v1987_v30 = vor.u32 %v2273_v18, %v1986_v13  ;;  %v2083_v31 = vor.u32 %v2297_v20, %v2082_v19  ;;  %v2246_v33 = vld [vmem:[#allocation5 + $0x158] sm:$0xf0]  ;;  %v2070_v41 = vld [vmem:[#allocation5 + $0x2d0] sm:$0xf]  ;;  %v1771_v43 = vor.u32 %v2219_v29, %v1770_v24  ;;  %v1866_v53 = vld [vmem:[#allocation5 + $0x138] sm:$0xf] }
  0x22   :  { %305 = vmatpush.bf16.msrb.mxu1 %v225_v61  ;;  %1110 = vmatpush.bf16.msrb.mxu3 %v1795_v10  ;;  %v2294_v42 = vld [vmem:[#allocation5 + $0x2d8] sm:$0xf0]  ;;  %v1879_v49 = vor.u32 %v2246_v33, %v1878_v32  ;;  %v2243_v54 = vld [vmem:[#allocation5 + $0x140] sm:$0xf0]  ;;  %v1962_v58 = vld [vmem:[#allocation5 + $0x1f8] sm:$0xf] }
  0x23   :  { %292 = vmatpush.bf16.msra.mxu0 %v1692_v2  ;;  %v2071_v52 = vor.u32 %v2294_v42, %v2070_v41  ;;  %v2267_v60 = vld [vmem:[#allocation5 + $0x200] sm:$0xf0]  ;;  %v2058_v63 = vld [vmem:[#allocation5 + $0x2b8] sm:$0xf]  ;;  %v1867_v1 = vor.u32 %v2243_v54, %v1866_v53  ;;  %v1758_v40 = vld [vmem:[#allocation5 + $0x60] sm:$0xf] }
  0x24   :  { %v2291_v0 = vld [vmem:[#allocation5 + $0x2c0] sm:$0xf0]  ;;  %v2216_v20 = vld [vmem:[#allocation5 + $0x68] sm:$0xf0]  ;;  %v1950_v24 = vld [vmem:[#allocation5 + $0x1e0] sm:$0xf] }
  0x25   :  { %264 = vmatpush.bf16.msrb.mxu2 %v1684_v35  ;;  %v1974_v35 = vld [vmem:[#allocation5 + $0x210] sm:$0xf]  ;;  %v2059_v5 = vor.u32 %v2291_v0, %v2058_v63  ;;  %v2288_v29 = vld [vmem:[#allocation5 + $0x2a8] sm:$0xf0]  ;;  %v2213_v32 = vld [vmem:[#allocation5 + $0x50] sm:$0xf0] }
  0x26   :  { %306 = vmatpush.bf16.msrb.mxu1 %v1696_v3  ;;  %1111 = vmatpush.bf16.msrb.mxu3 %v1783_v21  ;;  %v1854_v21 = vld [vmem:[#allocation5 + $0x120] sm:$0xf]  ;;  %v1842_v33 = vld [vmem:[#allocation5 + $0x108] sm:$0xf]  ;;  %v2234_v53 = vld [vmem:[#allocation5 + $0xf8] sm:$0xf0] }
  0x27   :  { %293 = vmatpush.bf16.msra.mxu0 %v1664_v22  ;;  %v1759_v22 = vor.u32 %v2216_v20, %v1758_v40  ;;  %v1926_v54 = vld [vmem:[#allocation5 + $0x1b0] sm:$0xf]  ;;  %v1722_v63 = vld [vmem:[#allocation5 + $0x18] sm:$0xf]  ;;  %v2207_v0 = vld [vmem:[#allocation5 + $0x20] sm:$0xf0] }
  0x28   :  { %v1998_v20 = vld [vmem:[#allocation5 + $0x240] sm:$0xf] }
  0x29   :  { %265 = vmatpush.bf16.msrb.mxu2 %v1656_v38 }
  0x2a   :  { %307 = vmatpush.bf16.msrb.mxu1 %v1668_v23  ;;  %1112 = vmatpush.bf16.msrb.mxu3 %v1771_v43  ;;  %v2240_v23 = vld [vmem:[#allocation5 + $0x128] sm:$0xf0]  ;;  %v2034_v43 = vld [vmem:[#allocation5 + $0x288] sm:$0xf] }
  0x2b   :  { %1124 = vmatpush.bf16.msrb.mxu0 %v1891_v28  ;;  %v2046_v28 = vld [vmem:[#allocation5 + $0x2a0] sm:$0xf] }
  0x2c   :  { %1705 = vmatmul.msk.bf16.vlgmr.msra.gmra.mxu0 %vm204_vm1, %v2506_v34 }
  0x2d   :  { %319 = vmatpush.bf16.msra.mxu2 %v228_v62 }
  0x2e   :  { %1138 = vmatpush.bf16.msra.mxu1 %v1987_v30  ;;  %1113 = vmatpush.bf16.msrb.mxu3 %v1759_v22  ;;  %v2047_v30 = vor.u32 %v2288_v29, %v2046_v28  ;;  %v2224_v22 = vld [vmem:[#allocation5 + $0xac] sm:$0xf] }
  0x2f   :  { %1125 = vmatpush.bf16.msrb.mxu0 %v1879_v49  ;;  %v2210_v49 = vld [vmem:[#allocation5 + $0x38] sm:$0xf0]  ;;  %v2272_v29 = vld [vmem:[#allocation5 + $0x22c] sm:$0xf] }
  0x30   :  { %1703 = vmatmul.msk.bf16.vlgmr.msrb.gmra.mxu2 %vm204_vm1, %v2506_v34  ;;  %1706 = vmatmul.msk.bf16.vlgmr.msrb.gmra.mxu1 %vm204_vm1, %v2506_v34 }
  0x31   :  { %320 = vmatpush.bf16.msra.mxu2 %v1700_v8 }
  0x33   :  { %1126 = vmatpush.bf16.msrb.mxu0 %v1867_v1  ;;  %v1818_v1 = vld [vmem:[#allocation5 + $0xd8] sm:$0xf] }
  0x35   :  { %321 = vmatpush.bf16.msra.mxu2 %v1672_v27 }
  0x39   :  { %1152 = vmatpush.bf16.msrb.mxu2 %v2083_v31  ;;  %v1746_v31 = vld [vmem:[#allocation5 + $0x48] sm:$0xf] }
  0x3d   :  { %1153 = vmatpush.bf16.msrb.mxu2 %v2071_v52 }
  0x40   :  { %1707 = vmatmul.msk.bf16.vlgmr.msra.gmra.mxu2 %vm204_vm1, %v2506_v34 }
  0x41   :  { %1154 = vmatpush.bf16.msrb.mxu2 %v2059_v5 }
  0x45   :  { %1155 = vmatpush.bf16.msrb.mxu2 %v2047_v30  ;;  %v1988_v30 = vld [vmem:[#allocation5 + $0x234] sm:$0xf0] }
  0x9d   :  { %v253_v55 = vpop.f32.mrf.mxu1 }
  0x9e   :  { %v2535_v17 = vadd.f32 %v331_v47, %v253_v55 }
  0xa0   :  { %v359_v37 = vmul.f32 %v2535_v17, %v2535_v17 }
  0xa3   :  { %v239_v39 = vpop.f32.mrf.mxu2 }
  0xa4   :  { %v2531_v16 = vadd.f32 %v330_v46, %v239_v39  ;;  %v281_v25 = vpop.f32.mrf.mxu3  ;;  %v2270_v39 = vld [vmem:[#allocation5 + $0x218] sm:$0xf0] }
  0xa5   :  { %v2544_v38 = vadd.f32 %v333_v59, %v281_v25  ;;  %v255_v44 = vpop.f32.mrf.mxu1  ;;  %v1975_v51 = vor.u32 %v2270_v39, %v1974_v35  ;;  %v2264_v25 = vld [vmem:[#allocation5 + $0x1e8] sm:$0xf0]  ;;  %v1747_v35 = vor.u32 %v2213_v32, %v1746_v31  ;;  %v2261_v39 = vld [vmem:[#allocation5 + $0x1d0] sm:$0xf0]  ;;  %v1991_v32 = vor.u32 %v2272_v29, %v1988_v30  ;;  %v2036_v30 = vld [vmem:[#allocation5 + $0x294] sm:$0xf0] }
  0xa6   :  { %v358_v36 = vmul.f32 %v2531_v16, %v2531_v16  ;;  %v348_v48 = vadd.f32 %v2535_v17, %v2531_v16  ;;  %v2554_v55 = vadd.f32 %v331_v47, %v255_v44  ;;  %v1951_v27 = vor.u32 %v2264_v25, %v1950_v24  ;;  %v2285_v44 = vld [vmem:[#allocation5 + $0x290] sm:$0xf0]  ;;  %v1796_v24 = vld [vmem:[#allocation5 + $0xb4] sm:$0xf0]  ;;  %v2248_v25 = vld [vmem:[#allocation5 + $0x16c] sm:$0xf] }
  0xa7   :  { %v361_v56 = vmul.f32 %v2544_v38, %v2544_v38  ;;  %1139 = vmatpush.bf16.msra.mxu1 %v1975_v51  ;;  %1114 = vmatpush.bf16.msrb.mxu3 %v1747_v35  ;;  %v1830_v51 = vld [vmem:[#allocation5 + $0xf0] sm:$0xf]  ;;  %v2296_v31 = vld [vmem:[#allocation5 + $0x2ec] sm:$0xf]  ;;  %v2221_v35 = vld [vmem:[#allocation5 + $0x94] sm:$0xf] }
  0xa8   :  { %v366_v57 = vadd.f32 %v359_v37, %v358_v36  ;;  %v2237_v36 = vld [vmem:[#allocation5 + $0x110] sm:$0xf0]  ;;  %v1938_v37 = vld [vmem:[#allocation5 + $0x1c8] sm:$0xf] }
  0xa9   :  { %v1843_v41 = vor.u32 %v2237_v36, %v1842_v33  ;;  %v1939_v42 = vor.u32 %v2261_v39, %v1938_v37  ;;  %v2084_v33 = vld [vmem:[#allocation5 + $0x2f4] sm:$0xf0]  ;;  %v1784_v36 = vld [vmem:[#allocation5 + $0x9c] sm:$0xf0] }
  0xaa   :  { %v2087_v37 = vor.u32 %v2296_v31, %v2084_v33  ;;  %v1787_v39 = vor.u32 %v2221_v35, %v1784_v36  ;;  %v2209_v33 = vld [vmem:[#allocation5 + $0x34] sm:$0xf]  ;;  %v1736_v35 = vld [vmem:[#allocation5 + $0x3c] sm:$0xf0] }
  0xab   :  { %v2527_v7 = vpop.f32.mrf.mxu2  ;;  %v2233_v36 = vld [vmem:[#allocation5 + $0xf4] sm:$0xf] }
  0xac   :  { %v2563_v61 = vadd.f32 %v330_v46, %v2527_v7  ;;  %v1963_v46 = vor.u32 %v2267_v60, %v1962_v58  ;;  %v283_v4 = vpop.f32.mrf.mxu3  ;;  %v363_v7 = vmul.f32 %v2554_v55, %v2554_v55  ;;  %v2022_v60 = vld [vmem:[#allocation5 + $0x270] sm:$0xf] }
  0xad   :  { %v2581_v10 = vadd.f32 %v333_v59, %v283_v4  ;;  %v2255_v4 = vld [vmem:[#allocation5 + $0x1a0] sm:$0xf0] }
  0xae   :  { %v362_v6 = vmul.f32 %v2563_v61, %v2563_v61  ;;  %v353_v34 = vadd.f32 %v2554_v55, %v2563_v61  ;;  %1140 = vmatpush.bf16.msra.mxu1 %v1963_v46  ;;  %v1914_v46 = vld [vmem:[#allocation5 + $0x198] sm:$0xf] }
  0xaf   :  { %v365_v18 = vmul.f32 %v2581_v10, %v2581_v10 }
  0xb0   :  { %v371_v14 = vadd.f32 %v363_v7, %v362_v6  ;;  %v1915_v6 = vor.u32 %v2255_v4, %v1914_v46  ;;  %v2010_v7 = vld [vmem:[#allocation5 + $0x258] sm:$0xf]  ;;  %v1760_v46 = vld [vmem:[#allocation5 + $0x6c] sm:$0xf0]  ;;  %v2239_v4 = vld [vmem:[#allocation5 + $0x124] sm:$0xf] }
  0xb2   :  { %1141 = vmatpush.bf16.msra.mxu1 %v1951_v27  ;;  %v1799_v27 = vor.u32 %v2224_v22, %v1796_v24  ;;  %v1844_v22 = vld [vmem:[#allocation5 + $0x114] sm:$0xf0] }
  0xb3   :  { %v267_v45 = vpop.f32.mrf.mxu2 }
  0xb4   :  { %v2550_v50 = vadd.f32 %v332_v26, %v267_v45  ;;  %v2035_v45 = vor.u32 %v2285_v44, %v2034_v43  ;;  %v2269_v43 = vld [vmem:[#allocation5 + $0x214] sm:$0xf] }
  0xb6   :  { %v349_v62 = vadd.f32 %v348_v48, %v2550_v50  ;;  %v360_v47 = vmul.f32 %v2550_v50, %v2550_v50  ;;  %1142 = vmatpush.bf16.msra.mxu1 %v1939_v42  ;;  %v1734_v48 = vld [vmem:[#allocation5 + $0x30] sm:$0xf]  ;;  %1156 = vmatpush.bf16.msrb.mxu2 %v2035_v45  ;;  %v1880_v42 = vld [vmem:[#allocation5 + $0x15c] sm:$0xf0] }
  0xb7   :  { %v1735_v52 = vor.u32 %v2210_v49, %v1734_v48  ;;  %v1976_v45 = vld [vmem:[#allocation5 + $0x21c] sm:$0xf0]  ;;  %v2293_v48 = vld [vmem:[#allocation5 + $0x2d4] sm:$0xf] }
  0xb8   :  { %v350_v2 = vadd.f32 %v349_v62, %v2544_v38  ;;  %v367_v3 = vadd.f32 %v366_v57, %v360_v47  ;;  %v1831_v57 = vor.u32 %v2234_v53, %v1830_v51  ;;  %v2282_v62 = vld [vmem:[#allocation5 + $0x278] sm:$0xf0]  ;;  %v2072_v49 = vld [vmem:[#allocation5 + $0x2dc] sm:$0xf0]  ;;  %v1979_v51 = vor.u32 %v2269_v43, %v1976_v45 }
  0xb9   :  { %1115 = vmatpush.bf16.msrb.mxu3 %v1735_v52  ;;  %v2023_v47 = vor.u32 %v2282_v62, %v2022_v60  ;;  %v2075_v52 = vor.u32 %v2293_v48, %v2072_v49  ;;  %v2218_v53 = vld [vmem:[#allocation5 + $0x7c] sm:$0xf]  ;;  %v1964_v62 = vld [vmem:[#allocation5 + $0x204] sm:$0xf0]  ;;  %v2281_v48 = vld [vmem:[#allocation5 + $0x274] sm:$0xf] }
  0xba   :  { %351 = vadd.xlane.f32.xlu0 %v350_v2  ;;  %v368_v8 = vadd.f32 %v367_v3, %v361_v56  ;;  %v2258_v56 = vld [vmem:[#allocation5 + $0x1b8] sm:$0xf0]  ;;  %v1723_v2 = vor.u32 %v2207_v0, %v1722_v63  ;;  %v2231_v3 = vld [vmem:[#allocation5 + $0xe0] sm:$0xf0]  ;;  %v2024_v49 = vld [vmem:[#allocation5 + $0x27c] sm:$0xf0] }
  0xbb   :  { %v269_v9 = vpop.f32.mrf.mxu2  ;;  %v1927_v58 = vor.u32 %v2258_v56, %v1926_v54  ;;  %1157 = vmatpush.bf16.msrb.mxu2 %v2023_v47  ;;  %v1819_v5 = vor.u32 %v2231_v3, %v1818_v1  ;;  %v1772_v54 = vld [vmem:[#allocation5 + $0x84] sm:$0xf0]  ;;  %v2242_v56 = vld [vmem:[#allocation5 + $0x13c] sm:$0xf]  ;;  %v2215_v3 = vld [vmem:[#allocation5 + $0x64] sm:$0xf] }
  0xbc   :  { %v2585_v11 = vadd.f32 %v332_v26, %v269_v9  ;;  %369 = vadd.xlane.f32.xlu1 %v368_v8  ;;  %v1855_v26 = vor.u32 %v2240_v23, %v1854_v21  ;;  %v2279_v8 = vld [vmem:[#allocation5 + $0x260] sm:$0xf0]  ;;  %v2276_v21 = vld [vmem:[#allocation5 + $0x248] sm:$0xf0]  ;;  %v2266_v60 = vld [vmem:[#allocation5 + $0x1fc] sm:$0xf] }
  0xbd   :  { %1143 = vmatpush.bf16.msra.mxu1 %v1927_v58  ;;  %1116 = vmatpush.bf16.msrb.mxu3 %v1723_v2  ;;  %v2011_v9 = vor.u32 %v2279_v8, %v2010_v7  ;;  %v1999_v23 = vor.u32 %v2276_v21, %v1998_v20  ;;  %v1868_v58 = vld [vmem:[#allocation5 + $0x144] sm:$0xf0]  ;;  %v1967_v63 = vor.u32 %v2266_v60, %v1964_v62  ;;  %v2290_v0 = vld [vmem:[#allocation5 + $0x2bc] sm:$0xf]  ;;  %v2263_v7 = vld [vmem:[#allocation5 + $0x1e4] sm:$0xf] }
  0xbe   :  { %v364_v12 = vmul.f32 %v2585_v11, %v2585_v11  ;;  %v354_v13 = vadd.f32 %v353_v34, %v2585_v11  ;;  %1127 = vmatpush.bf16.msrb.mxu0 %v1855_v26  ;;  %v1710_v34 = vld [vmem:[#allocation5] sm:$0xf]  ;;  %v1892_v26 = vld [vmem:[#allocation5 + $0x174] sm:$0xf0]  ;;  %v1871_v47 = vor.u32 %v2242_v56, %v1868_v58  ;;  %v2060_v1 = vld [vmem:[#allocation5 + $0x2c4] sm:$0xf0] }
  0xbf   :  { %1158 = vmatpush.bf16.msrb.mxu2 %v2011_v9  ;;  %v1895_v28 = vor.u32 %v2248_v25, %v1892_v26  ;;  %v2063_v2 = vor.u32 %v2290_v0, %v2060_v1  ;;  %v1952_v8 = vld [vmem:[#allocation5 + $0x1ec] sm:$0xf0]  ;;  %v2236_v21 = vld [vmem:[#allocation5 + $0x10c] sm:$0xf]  ;;  %v1940_v26 = vld [vmem:[#allocation5 + $0x1d4] sm:$0xf0] }
  0xc0   :  { %v355_v15 = vadd.f32 %v354_v13, %v2581_v10  ;;  %v372_v59 = vadd.f32 %v371_v14, %v364_v12  ;;  %v2204_v12 = vld [vmem:[#allocation5 + $0x8] sm:$0xf0]  ;;  %v1806_v13 = vld [vmem:[#allocation5 + $0xc0] sm:$0xf]  ;;  %v2230_v56 = vld [vmem:[#allocation5 + $0xdc] sm:$0xf] }
  0xc1   :  { %1144 = vmatpush.bf16.msra.mxu1 %v1915_v6  ;;  %v1711_v14 = vor.u32 %v2204_v12, %v1710_v34  ;;  %v1856_v6 = vld [vmem:[#allocation5 + $0x12c] sm:$0xf0]  ;;  %v1955_v34 = vor.u32 %v2263_v7, %v1952_v8  ;;  %v2287_v12 = vld [vmem:[#allocation5 + $0x2a4] sm:$0xf]  ;;  %v1820_v60 = vld [vmem:[#allocation5 + $0xe4] sm:$0xf0] }
  0xc2   :  { %356 = vadd.xlane.f32.xlu0 %v355_v15  ;;  %v373_v19 = vadd.f32 %v372_v59, %v365_v18  ;;  %1128 = vmatpush.bf16.msrb.mxu0 %v1843_v41  ;;  %v2228_v15 = vld [vmem:[#allocation5 + $0xc8] sm:$0xf0]  ;;  %v1902_v18 = vld [vmem:[#allocation5 + $0x180] sm:$0xf]  ;;  %v2245_v41 = vld [vmem:[#allocation5 + $0x154] sm:$0xf]  ;;  %v1859_v9 = vor.u32 %v2239_v4, %v1856_v6 }
  0xc3   :  { %v2252_v59 = vld [vmem:[#allocation5 + $0x188] sm:$0xf0]  ;;  %1117 = vmatpush.bf16.msrb.mxu3 %v1711_v14  ;;  %1159 = vmatpush.bf16.msrb.mxu2 %v1999_v23  ;;  %v1883_v44 = vor.u32 %v2245_v41, %v1880_v42  ;;  %v2257_v41 = vld [vmem:[#allocation5 + $0x1b4] sm:$0xf]  ;;  %v1928_v42 = vld [vmem:[#allocation5 + $0x1bc] sm:$0xf0] }
  0xc4   :  { %374 = vadd.xlane.f32.xlu1 %v373_v19  ;;  %v1807_v19 = vor.u32 %v2228_v15, %v1806_v13  ;;  %v1903_v40 = vor.u32 %v2252_v59, %v1902_v18  ;;  %v2048_v13 = vld [vmem:[#allocation5 + $0x2ac] sm:$0xf0]  ;;  %v2212_v59 = vld [vmem:[#allocation5 + $0x4c] sm:$0xf]  ;;  %v1931_v45 = vor.u32 %v2257_v41, %v1928_v42  ;;  %v2254_v0 = vld [vmem:[#allocation5 + $0x19c] sm:$0xf] }
  0xc5   :  { %v2051_v15 = vor.u32 %v2287_v12, %v2048_v13  ;;  %v2260_v23 = vld [vmem:[#allocation5 + $0x1cc] sm:$0xf]  ;;  %v1916_v1 = vld [vmem:[#allocation5 + $0x1a4] sm:$0xf0]  ;;  %v2203_v8 = vld [vmem:[#allocation5 + $0x4] sm:$0xf] }
  0xc6   :  { %1129 = vmatpush.bf16.msrb.mxu0 %v1831_v57  ;;  %1145 = vmatpush.bf16.msra.mxu1 %v1903_v40  ;;  %v1775_v57 = vor.u32 %v2218_v53, %v1772_v54  ;;  %v1943_v29 = vor.u32 %v2260_v23, %v1940_v26  ;;  %v2206_v53 = vld [vmem:[#allocation5 + $0x1c] sm:$0xf]  ;;  %v1724_v54 = vld [vmem:[#allocation5 + $0x24] sm:$0xf0]  ;;  %v2227_v12 = vld [vmem:[#allocation5 + $0xc4] sm:$0xf] }
  0xc7   :  { %1166 = vmatpush.bf16.msra.mxu3 %v1799_v27  ;;  %1208 = vmatpush.bf16.msra.mxu2 %v2087_v37  ;;  %v2284_v27 = vld [vmem:[#allocation5 + $0x28c] sm:$0xf]  ;;  %v1739_v37 = vor.u32 %v2209_v33, %v1736_v35  ;;  %v1808_v13 = vld [vmem:[#allocation5 + $0xcc] sm:$0xf0] }
  0xca   :  { %1130 = vmatpush.bf16.msrb.mxu0 %v1819_v5  ;;  %1194 = vmatpush.bf16.msrb.mxu1 %v1991_v32  ;;  %v1763_v5 = vor.u32 %v2215_v3, %v1760_v46  ;;  %v2039_v32 = vor.u32 %v2284_v27, %v2036_v30  ;;  %v2012_v3 = vld [vmem:[#allocation5 + $0x264] sm:$0xf0] }
  0xcb   :  { %1167 = vmatpush.bf16.msra.mxu3 %v1787_v39  ;;  %1209 = vmatpush.bf16.msra.mxu2 %v2075_v52  ;;  %v1832_v39 = vld [vmem:[#allocation5 + $0xfc] sm:$0xf0]  ;;  %v2027_v52 = vor.u32 %v2281_v48, %v2024_v49 }
  0xce   :  { %1131 = vmatpush.bf16.msrb.mxu0 %v1807_v19  ;;  %1195 = vmatpush.bf16.msrb.mxu1 %v1979_v51  ;;  %v1748_v19 = vld [vmem:[#allocation5 + $0x54] sm:$0xf0] }
  0xcf   :  { %1168 = vmatpush.bf16.msra.mxu3 %v1775_v57  ;;  %1210 = vmatpush.bf16.msra.mxu2 %v2063_v2  ;;  %v1751_v20 = vor.u32 %v2212_v59, %v1748_v19  ;;  %v2278_v2 = vld [vmem:[#allocation5 + $0x25c] sm:$0xf]  ;;  %v1811_v59 = vor.u32 %v2227_v12, %v1808_v13  ;;  %v1904_v19 = vld [vmem:[#allocation5 + $0x18c] sm:$0xf0] }
  0xd0   :  { %v2015_v6 = vor.u32 %v2278_v2, %v2012_v3 }
  0xd2   :  { %1180 = vmatpush.bf16.msra.mxu0 %v1895_v28  ;;  %1196 = vmatpush.bf16.msrb.mxu1 %v1967_v63  ;;  %v1847_v28 = vor.u32 %v2236_v21, %v1844_v22  ;;  %v1823_v63 = vor.u32 %v2230_v56, %v1820_v60  ;;  %v2000_v22 = vld [vmem:[#allocation5 + $0x24c] sm:$0xf0] }
  0xd3   :  { %1169 = vmatpush.bf16.msra.mxu3 %v1763_v5  ;;  %1211 = vmatpush.bf16.msra.mxu2 %v2051_v15  ;;  %v1919_v5 = vor.u32 %v2254_v0, %v1916_v1 }
  0xd6   :  { %1181 = vmatpush.bf16.msra.mxu0 %v1883_v44  ;;  %1197 = vmatpush.bf16.msrb.mxu1 %v1955_v34  ;;  %v1835_v44 = vor.u32 %v2233_v36, %v1832_v39 }
  0xd7   :  { %1170 = vmatpush.bf16.msra.mxu3 %v1751_v20  ;;  %1212 = vmatpush.bf16.msra.mxu2 %v2039_v32 }
  0xda   :  { %1182 = vmatpush.bf16.msra.mxu0 %v1871_v47  ;;  %1198 = vmatpush.bf16.msrb.mxu1 %v1943_v29  ;;  %v1727_v47 = vor.u32 %v2206_v53, %v1724_v54  ;;  %v346_v29 = vld [vmem:[%s2697_s3] sm:$0xf] }
  0xdb   :  { %1171 = vmatpush.bf16.msra.mxu3 %v1739_v37  ;;  %1213 = vmatpush.bf16.msra.mxu2 %v2027_v52  ;;  %v425_v36 = vperm.slane %v346_v29, 0  ;;  %v427_v48 = vperm.slane %v346_v29, 2  ;;  %v428_v49 = vperm.slane %v346_v29, 3 }
  0xde   :  { %1183 = vmatpush.bf16.msra.mxu0 %v1859_v9  ;;  %1199 = vmatpush.bf16.msrb.mxu1 %v1931_v45  ;;  %v1712_v9 = vld [vmem:[#allocation5 + $0xc] sm:$0xf0]  ;;  %v426_v45 = vperm.slane %v346_v29, 1 }
  0xdf   :  { %1172 = vmatpush.bf16.msra.mxu3 %v1727_v47  ;;  %v1715_v34 = vor.u32 %v2203_v8, %v1712_v9  ;;  %1214 = vmatpush.bf16.msra.mxu2 %v2015_v6 }
  0xe2   :  { %1184 = vmatpush.bf16.msra.mxu0 %v1847_v28  ;;  %1200 = vmatpush.bf16.msrb.mxu1 %v1919_v5 }
  0xe3   :  { %1173 = vmatpush.bf16.msra.mxu3 %v1715_v34 }
  0xe6   :  { %1185 = vmatpush.bf16.msra.mxu0 %v1835_v44 }
  0xea   :  { %1186 = vmatpush.bf16.msra.mxu0 %v1823_v63 }
  0xee   :  { %1187 = vmatpush.bf16.msra.mxu0 %v1811_v59  ;;  %v1898_v59 = vld [vmem:[#allocation5 + $0x170] sm:$0xf] }
 0x12d   :  { %v352_v14 = vpop.xlane.xlu0 %351 }
 0x12e   :  { %v2593_v18 = vmul.f32 0.0025, %v352_v14  ;;  %v2251_v14 = vld [vmem:[#allocation5 + $0x184] sm:$0xf] }
 0x12f   :  { %v370_v40 = vpop.xlane.xlu1 %369  ;;  %v1907_v21 = vor.u32 %v2251_v14, %v1904_v19  ;;  %v1802_v14 = vld [vmem:[#allocation5 + $0xb0] sm:$0xf] }
 0x130   :  { %v378_v24 = vmul.f32 0.0025, %v370_v40  ;;  %v380_v25 = vmul.f32 %v2593_v18, %v2593_v18  ;;  %v2275_v40 = vld [vmem:[#allocation5 + $0x244] sm:$0xf]  ;;  %v408_v35 = vsub.f32 %v2531_v16, %v2593_v18  ;;  %v410_v37 = vsub.f32 %v2550_v50, %v2593_v18 }
 0x131   :  { %1201 = vmatpush.bf16.msrb.mxu1 %v1907_v21  ;;  %v411_v39 = vsub.f32 %v2544_v38, %v2593_v18  ;;  %v409_v42 = vsub.f32 %v2535_v17, %v2593_v18  ;;  %v2274_v21 = vld [vmem:[#allocation5 + $0x238] sm:$0xf0] }
 0x132   :  { %v382_v31 = vsub.f32 %v378_v24, %v380_v25  ;;  %v2003_v25 = vor.u32 %v2275_v40, %v2000_v22 }
 0x134   :  { %v384_v43 = vmax.f32 %v382_v31, 0.0  ;;  %1215 = vmatpush.bf16.msra.mxu2 %v2003_v25 }
 0x135   :  { %v357_v51 = vpop.xlane.xlu0 %356 }
 0x136   :  { %v386_v57 = vadd.f32 1e-05, %v384_v43  ;;  %v2597_v58 = vmul.f32 0.0025, %v357_v51  ;;  %v347_v43 = vld [vmem:[%s2698_s4] sm:$0xf] }
 0x137   :  { %v375_v62 = vpop.xlane.xlu1 %374  ;;  %v442_v54 = vperm.slane %v347_v43, 0  ;;  %v443_v38 = vperm.slane %v347_v43, 1  ;;  %v445_v17 = vperm.slane %v347_v43, 3 }
 0x138   :  { %2337 = vrsqrt.f32 %v386_v57  ;;  %v379_v46 = vmul.f32 0.0025, %v375_v62  ;;  %v381_v4 = vmul.f32 %v2597_v58, %v2597_v58  ;;  %vm394_vm3 = vweird.f32 %v386_v57 }
 0x139   :  { %v414_v63 = vsub.f32 %v2585_v11, %v2597_v58  ;;  %v415_v0 = vsub.f32 %v2581_v10, %v2597_v58  ;;  %v412_v1 = vsub.f32 %v2563_v61, %v2597_v58  ;;  %v413_v2 = vsub.f32 %v2554_v55, %v2597_v58  ;;  %v2250_v58 = vld [vmem:[#allocation5 + $0x178] sm:$0xf0] }
 0x13a   :  { %v383_v7 = vsub.f32 %v379_v46, %v381_v4 }
 0x13c   :  { %v385_v15 = vmax.f32 %v383_v7, 0.0 }
 0x13e   :  { %v2338_v20 = vpop.eup %2337  ;;  %v387_v24 = vadd.f32 1e-05, %v385_v15  ;;  %v2226_v15 = vld [vmem:[#allocation5 + $0xb8] sm:$0xf0] }
 0x13f   :  { %v389_v23 = vmul.f32 %v2338_v20, %v386_v57  ;;  %vm395_vm2 = vweird.f32 %v2338_v20  ;;  %v444_v57 = vperm.slane %v347_v43, 2 }
 0x140   :  { %2339 = vrsqrt.f32 %v387_v24  ;;  %vm396_vm4 = vmor %vm394_vm3, %vm395_vm2  ;;  %vm404_vm6 = vweird.f32 %v387_v24 }
 0x141   :  { %v390_v26 = vmul.f32 %v2338_v20, %v389_v23 }
 0x143   :  { %v391_v27 = vmul.f32 0.5, %v390_v26  ;;  %v2090_v26 = vld [vmem:[#allocation5 + $0x2f0] sm:$0xf] }
 0x145   :  { %v392_v28 = vsub.f32 1.5, %v391_v27 }
 0x146   :  { %v2340_v30 = vpop.eup %2339 }
 0x147   :  { %v393_v31 = vmul.f32 %v2338_v20, %v392_v28  ;;  %v399_v32 = vmul.f32 %v2340_v30, %v387_v24  ;;  %vm405_vm5 = vweird.f32 %v2340_v30 }
 0x148   :  { %vm406_vm7 = vmor %vm404_vm6, %vm405_vm5 }
 0x149   :  { %v397_v33 = vsel %vm396_vm4, %v2338_v20, %v393_v31  ;;  %v400_v41 = vmul.f32 %v2340_v30, %v399_v32  ;;  %v1994_v20 = vld [vmem:[#allocation5 + $0x230] sm:$0xf]  ;;  %v2298_v31 = vld [vmem:[#allocation5 + $0x2f8] sm:$0xf0]  ;;  %v1803_v32 = vor.u32 %v2226_v15, %v1802_v14 }
 0x14a   :  { %v416_v44 = vmul.f32 %v408_v35, %v397_v33  ;;  %v417_v51 = vmul.f32 %v409_v42, %v397_v33  ;;  %v418_v52 = vmul.f32 %v410_v37, %v397_v33  ;;  %v419_v53 = vmul.f32 %v411_v39, %v397_v33  ;;  %v2223_v42 = vld [vmem:[#allocation5 + $0xa0] sm:$0xf0] }
 0x14b   :  { %v401_v16 = vmul.f32 0.5, %v400_v41  ;;  %v1899_v33 = vor.u32 %v2250_v58, %v1898_v59  ;;  %v1790_v41 = vld [vmem:[#allocation5 + $0x98] sm:$0xf]  ;;  %v1995_v43 = vor.u32 %v2274_v21, %v1994_v20  ;;  %v1850_v59 = vld [vmem:[#allocation5 + $0x110] sm:$0xf] }
 0x14c   :  { %v433_v56 = vmul.f32 %v425_v36, %v416_v44  ;;  %v434_v60 = vmul.f32 %v426_v45, %v417_v51  ;;  %v435_v62 = vmul.f32 %v427_v48, %v418_v52  ;;  %v436_v47 = vmul.f32 %v428_v49, %v419_v53  ;;  %v2078_v51 = vld [vmem:[#allocation5 + $0x2d8] sm:$0xf]  ;;  %v2295_v52 = vld [vmem:[#allocation5 + $0x2e0] sm:$0xf0]  ;;  %v2286_v58 = vld [vmem:[#allocation5 + $0x298] sm:$0xf0] }
 0x14d   :  { %v402_v50 = vsub.f32 1.5, %v401_v16  ;;  %v2091_v44 = vor.u32 %v2298_v31, %v2090_v26  ;;  %v2271_v16 = vld [vmem:[#allocation5 + $0x220] sm:$0xf0]  ;;  %v1791_v53 = vor.u32 %v2223_v42, %v1790_v41  ;;  %v1838_v26 = vld [vmem:[#allocation5 + $0xf8] sm:$0xf] }
 0x14e   :  { %v450_v7 = vadd.f32 %v442_v54, %v433_v56  ;;  %v451_v8 = vadd.f32 %v443_v38, %v434_v60  ;;  %v452_v9 = vadd.f32 %v444_v57, %v435_v62  ;;  %v453_v34 = vadd.f32 %v445_v17, %v436_v47  ;;  %v1970_v60 = vld [vmem:[#allocation5 + $0x200] sm:$0xf]  ;;  %v2268_v62 = vld [vmem:[#allocation5 + $0x208] sm:$0xf0]  ;;  %v2283_v31 = vld [vmem:[#allocation5 + $0x280] sm:$0xf0] }
 0x14f   :  { %v403_v18 = vmul.f32 %v2340_v30, %v402_v50  ;;  %v2066_v47 = vld [vmem:[#allocation5 + $0x2c0] sm:$0xf]  ;;  %v2208_v42 = vld [vmem:[#allocation5 + $0x28] sm:$0xf0] }
 0x150   :  { %v458_v22 = vmax.f32 %v450_v7, 0.0  ;;  %v459_v23 = vmax.f32 %v451_v8, 0.0  ;;  %v460_v24 = vmax.f32 %v452_v9, 0.0  ;;  %v461_v25 = vmax.f32 %v453_v34, 0.0  ;;  %v1958_v7 = vld [vmem:[#allocation5 + $0x1e8] sm:$0xf] }
 0x151   :  { %v407_v3 = vsel %vm406_vm7, %v2340_v30, %v403_v18  ;;  %v2244_v18 = vld [vmem:[#allocation5 + $0x148] sm:$0xf0]  ;;  %v2265_v8 = vld [vmem:[#allocation5 + $0x1f0] sm:$0xf0]  ;;  %v2054_v9 = vld [vmem:[#allocation5 + $0x2a8] sm:$0xf] }
 0x152   :  { %v420_v46 = vmul.f32 %v412_v1, %v407_v3  ;;  %v421_v4 = vmul.f32 %v413_v2, %v407_v3  ;;  %v422_v5 = vmul.f32 %v414_v63, %v407_v3  ;;  %v423_v6 = vmul.f32 %v415_v0, %v407_v3  ;;  %v2292_v63 = vld [vmem:[#allocation5 + $0x2c8] sm:$0xf0]  ;;  %v1766_v2 = vld [vmem:[#allocation5 + $0x68] sm:$0xf]  ;;  %v2217_v3 = vld [vmem:[#allocation5 + $0x70] sm:$0xf0] }
 0x153   :  { %v2289_v34 = vld [vmem:[#allocation5 + $0x2b0] sm:$0xf0]  ;;  %v1959_v14 = vor.u32 %v2265_v8, %v1958_v7  ;;  %v1730_v41 = vld [vmem:[#allocation5 + $0x20] sm:$0xf] }
 0x154   :  { %v437_v11 = vmul.f32 %v425_v36, %v420_v46  ;;  %v438_v12 = vmul.f32 %v426_v45, %v421_v4  ;;  %v439_v13 = vmul.f32 %v427_v48, %v422_v5  ;;  %v440_v10 = vmul.f32 %v428_v49, %v423_v6  ;;  %v1886_v45 = vld [vmem:[#allocation5 + $0x158] sm:$0xf]  ;;  %v2247_v48 = vld [vmem:[#allocation5 + $0x160] sm:$0xf0]  ;;  %v1862_v5 = vld [vmem:[#allocation5 + $0x128] sm:$0xf] }
 0x155   :  { %v1982_v49 = vld [vmem:[#allocation5 + $0x218] sm:$0xf]  ;;  %v1887_v50 = vor.u32 %v2247_v48, %v1886_v45  ;;  %v1971_v46 = vor.u32 %v2268_v62, %v1970_v60  ;;  %v2067_v4 = vor.u32 %v2292_v63, %v2066_v47  ;;  %v2241_v6 = vld [vmem:[#allocation5 + $0x130] sm:$0xf0]  ;;  %v2055_v15 = vor.u32 %v2289_v34, %v2054_v9  ;;  %v1826_v45 = vld [vmem:[#allocation5 + $0xe0] sm:$0xf] }
 0x156   :  { %v454_v61 = vadd.f32 %v442_v54, %v437_v11  ;;  %v455_v19 = vadd.f32 %v443_v38, %v438_v12  ;;  %v456_v40 = vadd.f32 %v444_v57, %v439_v13  ;;  %v457_v55 = vadd.f32 %v445_v17, %v440_v10  ;;  %v1778_v54 = vld [vmem:[#allocation5 + $0x80] sm:$0xf]  ;;  %v2220_v38 = vld [vmem:[#allocation5 + $0x88] sm:$0xf0]  ;;  %v1754_v13 = vld [vmem:[#allocation5 + $0x50] sm:$0xf] }
 0x157   :  { %v1983_v56 = vor.u32 %v2271_v16, %v1982_v49  ;;  %v2079_v57 = vor.u32 %v2295_v52, %v2078_v51  ;;  %v1874_v17 = vld [vmem:[#allocation5 + $0x140] sm:$0xf]  ;;  %v1779_v0 = vor.u32 %v2220_v38, %v1778_v54  ;;  %v1767_v11 = vor.u32 %v2217_v3, %v1766_v2  ;;  %v2214_v10 = vld [vmem:[#allocation5 + $0x58] sm:$0xf0]  ;;  %v2232_v48 = vld [vmem:[#allocation5 + $0xe8] sm:$0xf0] }
 0x158   :  { %v462_v27 = vmax.f32 %v454_v61, 0.0  ;;  %v463_v28 = vmax.f32 %v455_v19, 0.0  ;;  %v464_v29 = vmax.f32 %v456_v40, 0.0  ;;  %v465_v30 = vmax.f32 %v457_v55, 0.0  ;;  %v2238_v61 = vld [vmem:[#allocation5 + $0x118] sm:$0xf0] }
 0x159   :  { %v1875_v1 = vor.u32 %v2244_v18, %v1874_v17  ;;  %v1863_v12 = vor.u32 %v2241_v6, %v1862_v5  ;;  %v1946_v19 = vld [vmem:[#allocation5 + $0x1d0] sm:$0xf]  ;;  %v2262_v40 = vld [vmem:[#allocation5 + $0x1d8] sm:$0xf0]  ;;  %v1755_v20 = vor.u32 %v2214_v10, %v1754_v13  ;;  %v1851_v21 = vor.u32 %v2238_v61, %v1850_v59  ;;  %v1922_v49 = vld [vmem:[#allocation5 + $0x1a0] sm:$0xf]  ;;  %v323_v5 = vpop.f32.mrf.mxu2 }
 0x15a   :  { %v2623_v35 = vpack.c.bf16 %v462_v27, %v458_v22  ;;  %v2625_v36 = vpack.c.bf16 %v463_v28, %v459_v23  ;;  %v2627_v37 = vpack.c.bf16 %v464_v29, %v460_v24  ;;  %v2629_v39 = vpack.c.bf16 %v465_v30, %v461_v25  ;;  %v2042_v55 = vld [vmem:[#allocation5 + $0x290] sm:$0xf]  ;;  %v1742_v22 = vld [vmem:[#allocation5 + $0x38] sm:$0xf]  ;;  %v2211_v23 = vld [vmem:[#allocation5 + $0x40] sm:$0xf0] }
 0x15b   :  { %v1947_v24 = vor.u32 %v2262_v40, %v1946_v19  ;;  %v2043_v25 = vor.u32 %v2286_v58, %v2042_v55  ;;  %v2235_v27 = vld [vmem:[#allocation5 + $0x100] sm:$0xf0]  ;;  %v1934_v28 = vld [vmem:[#allocation5 + $0x1b8] sm:$0xf]  ;;  %v2256_v16 = vld [vmem:[#allocation5 + $0x1a8] sm:$0xf0] }
 0x15c   :  { %1118 = vmatmul.bf16.vlgmr.msrb.gmra.mxu3 %v2623_v35  ;;  %1132 = vmatmul.bf16.vlgmr.msrb.gmra.mxu0 %v2625_v36  ;;  %v2259_v29 = vld [vmem:[#allocation5 + $0x1c0] sm:$0xf0]  ;;  %v2030_v30 = vld [vmem:[#allocation5 + $0x278] sm:$0xf]  ;;  %v2018_v51 = vld [vmem:[#allocation5 + $0x260] sm:$0xf] }
 0x15d   :  { %1146 = vmatmul.bf16.vlgmr.msra.gmra.mxu1 %v2627_v37  ;;  %1160 = vmatmul.bf16.vlgmr.msrb.gmra.mxu2 %v2629_v39  ;;  %v2280_v52 = vld [vmem:[#allocation5 + $0x268] sm:$0xf0]  ;;  %v1718_v54 = vld [vmem:[#allocation5 + $0x8] sm:$0xf]  ;;  %v2205_v38 = vld [vmem:[#allocation5 + $0x10] sm:$0xf0] }
 0x15e   :  { %1222 = vmatpush.bf16.msrb.mxu3 %v1803_v32  ;;  %1236 = vmatpush.bf16.msrb.mxu0 %v1899_v33  ;;  %v1743_v32 = vor.u32 %v2211_v23, %v1742_v22  ;;  %v1839_v33 = vor.u32 %v2235_v27, %v1838_v26  ;;  %v1814_v17 = vld [vmem:[#allocation5 + $0xc8] sm:$0xf]  ;;  %v2229_v18 = vld [vmem:[#allocation5 + $0xd0] sm:$0xf0] }
 0x15f   :  { %1250 = vmatpush.bf16.msra.mxu1 %v1995_v43  ;;  %1264 = vmatpush.bf16.msrb.mxu2 %v2091_v44  ;;  %v1935_v43 = vor.u32 %v2259_v29, %v1934_v28  ;;  %v2031_v44 = vor.u32 %v2283_v31, %v2030_v30  ;;  %v1910_v60 = vld [vmem:[#allocation5 + $0x188] sm:$0xf]  ;;  %v2253_v62 = vld [vmem:[#allocation5 + $0x190] sm:$0xf0] }
 0x160   :  { %v2006_v47 = vld [vmem:[#allocation5 + $0x248] sm:$0xf]  ;;  %v2277_v63 = vld [vmem:[#allocation5 + $0x250] sm:$0xf0]  ;;  %v1911_v2 = vor.u32 %v2253_v62, %v1910_v60 }
 0x161   :  { %v2007_v3 = vor.u32 %v2277_v63, %v2006_v47  ;;  %v325_v8 = vpop.f32.mrf.mxu2 }
 0x162   :  { %1223 = vmatpush.bf16.msrb.mxu3 %v1791_v53  ;;  %1237 = vmatpush.bf16.msrb.mxu0 %v1887_v50  ;;  %v1731_v53 = vor.u32 %v2208_v42, %v1730_v41  ;;  %v1827_v50 = vor.u32 %v2232_v48, %v1826_v45 }
 0x163   :  { %1251 = vmatpush.bf16.msra.mxu1 %v1983_v56  ;;  %1265 = vmatpush.bf16.msrb.mxu2 %v2079_v57  ;;  %v1923_v56 = vor.u32 %v2256_v16, %v1922_v49  ;;  %v2019_v57 = vor.u32 %v2280_v52, %v2018_v51 }
 0x166   :  { %1224 = vmatpush.bf16.msrb.mxu3 %v1779_v0  ;;  %1238 = vmatpush.bf16.msrb.mxu0 %v1875_v1  ;;  %v1719_v0 = vor.u32 %v2205_v38, %v1718_v54  ;;  %v1815_v1 = vor.u32 %v2229_v18, %v1814_v17 }
 0x167   :  { %1252 = vmatpush.bf16.msra.mxu1 %v1971_v46  ;;  %1266 = vmatpush.bf16.msrb.mxu2 %v2067_v4  ;;  %v295_v46 = vpop.f32.mrf.mxu0  ;;  %v309_v4 = vpop.f32.mrf.mxu1 }
 0x16a   :  { %1225 = vmatpush.bf16.msrb.mxu3 %v1767_v11  ;;  %1239 = vmatpush.bf16.msrb.mxu0 %v1863_v12 }
 0x16b   :  { %1253 = vmatpush.bf16.msra.mxu1 %v1959_v14  ;;  %1267 = vmatpush.bf16.msrb.mxu2 %v2055_v15 }
 0x16c   :  { %1174 = vmatmul.bf16.vlgmr.msra.gmra.mxu3 %v2623_v35  ;;  %1188 = vmatmul.bf16.vlgmr.msra.gmra.mxu0 %v2625_v36 }
 0x16d   :  { %1202 = vmatmul.bf16.vlgmr.msrb.gmra.mxu1 %v2627_v37  ;;  %1216 = vmatmul.bf16.vlgmr.msra.gmra.mxu2 %v2629_v39 }
 0x16e   :  { %1226 = vmatpush.bf16.msrb.mxu3 %v1755_v20  ;;  %1240 = vmatpush.bf16.msrb.mxu0 %v1851_v21 }
 0x16f   :  { %1254 = vmatpush.bf16.msra.mxu1 %v1947_v24  ;;  %1268 = vmatpush.bf16.msrb.mxu2 %v2043_v25  ;;  %v297_v6 = vpop.f32.mrf.mxu0  ;;  %v311_v7 = vpop.f32.mrf.mxu1  ;;  %v1278_v25 = vld [vmem:[%s2700_s6] sm:$0x7] }
 0x170   :  { %v1281_v28 = vperm.slane %v1278_v25, 1  ;;  %v1280_v31 = vperm.slane %v1278_v25, 0 }
 0x172   :  { %1227 = vmatpush.bf16.msrb.mxu3 %v1743_v32  ;;  %1241 = vmatpush.bf16.msrb.mxu0 %v1839_v33 }
 0x173   :  { %1255 = vmatpush.bf16.msra.mxu1 %v1935_v43  ;;  %1269 = vmatpush.bf16.msrb.mxu2 %v2031_v44 }
 0x176   :  { %1228 = vmatpush.bf16.msrb.mxu3 %v1731_v53  ;;  %1242 = vmatpush.bf16.msrb.mxu0 %v1827_v50  ;;  %v1282_v53 = vperm.slane %v1278_v25, 2 }
 0x177   :  { %1256 = vmatpush.bf16.msra.mxu1 %v1923_v56  ;;  %1270 = vmatpush.bf16.msrb.mxu2 %v2019_v57 }
 0x17a   :  { %1229 = vmatpush.bf16.msrb.mxu3 %v1719_v0  ;;  %1243 = vmatpush.bf16.msrb.mxu0 %v1815_v1 }
 0x17b   :  { %1257 = vmatpush.bf16.msra.mxu1 %v1911_v2  ;;  %1271 = vmatpush.bf16.msrb.mxu2 %v2007_v3 }
 0x17d   :  { %1230 = vmatmul.bf16.vlgmr.msrb.gmra.mxu3 %v2623_v35  ;;  %1244 = vmatmul.bf16.vlgmr.msrb.gmra.mxu0 %v2625_v36 }
 0x17e   :  { %1258 = vmatmul.bf16.vlgmr.msra.gmra.mxu1 %v2627_v37  ;;  %1272 = vmatmul.bf16.vlgmr.msrb.gmra.mxu2 %v2629_v39 }
 0x1d9   :  { %v1133_v9 = vpop.f32.mrf.mxu0 }
 0x1da   :  { %v1147_v34 = vpop.f32.mrf.mxu1 }
 0x1df   :  { %v1119_v11 = vpop.f32.mrf.mxu3 }
 0x1e0   :  { %v1161_v12 = vpop.f32.mrf.mxu2  ;;  %v1120_v39 = vadd.f32 %v1119_v11, %v295_v46 }
 0x1e1   :  { %v1135_v13 = vpop.f32.mrf.mxu0 }
 0x1e2   :  { %v1149_v10 = vpop.f32.mrf.mxu1  ;;  %v1134_v58 = vadd.f32 %v1133_v9, %v1120_v39  ;;  %v2321_v39 = vld [vmem:[#allocation7 + $0xb0] sm:$0xff] }
 0x1e4   :  { %v1148_v24 = vadd.f32 %v1147_v34, %v1134_v58  ;;  %v2303_v58 = vld [vmem:[#allocation7 + $0x20] sm:$0xff] }
 0x1e6   :  { %v1162_v30 = vadd.f32 %v1161_v12, %v1148_v24  ;;  %v2318_v24 = vld [vmem:[#allocation7 + $0x98] sm:$0xff] }
 0x1e7   :  { %v1121_v14 = vpop.f32.mrf.mxu3 }
 0x1e8   :  { %v1163_v35 = vpop.f32.mrf.mxu2  ;;  %v1122_v26 = vadd.f32 %v1121_v14, %v297_v6  ;;  %v2648_v49 = vadd.f32 %v1280_v31, %v1162_v30  ;;  %v2309_v30 = vld [vmem:[#allocation7 + $0x50] sm:$0xff] }
 0x1e9   :  { %v1189_v15 = vpop.f32.mrf.mxu0 }
 0x1ea   :  { %v1203_v36 = vpop.f32.mrf.mxu1  ;;  %v1136_v41 = vadd.f32 %v1135_v13, %v1122_v26  ;;  %v1302_v57 = vmul.f32 %v2648_v49, %v2648_v49 }
 0x1ec   :  { %v1150_v51 = vadd.f32 %v1149_v10, %v1136_v41  ;;  %v2300_v41 = vld [vmem:[#allocation7 + $0x8] sm:$0xff] }
 0x1ee   :  { %v1164_v17 = vadd.f32 %v1163_v35, %v1150_v51  ;;  %v2299_v51 = vld [vmem:[#allocation7] sm:$0xff] }
 0x1ef   :  { %v1175_v59 = vpop.f32.mrf.mxu3 }
 0x1f0   :  { %v1217_v37 = vpop.f32.mrf.mxu2  ;;  %v1176_v61 = vadd.f32 %v1175_v59, %v309_v4  ;;  %v2663_v4 = vadd.f32 %v1280_v31, %v1164_v17  ;;  %v2322_v59 = vld [vmem:[#allocation7 + $0xb8] sm:$0xff]  ;;  %v2317_v31 = vld [vmem:[#allocation7 + $0x90] sm:$0xff] }
 0x1f1   :  { %v1191_v40 = vpop.f32.mrf.mxu0  ;;  %1617 = vmatpush.bf16.msrb.mxu1 %v2322_v59 }
 0x1f2   :  { %v1190_v19 = vadd.f32 %v1189_v15, %v1176_v61  ;;  %v1205_v20 = vpop.f32.mrf.mxu1  ;;  %v1305_v12 = vmul.f32 %v2663_v4, %v2663_v4  ;;  %v2306_v15 = vld [vmem:[#allocation7 + $0x38] sm:$0xff]  ;;  %v2313_v61 = vld [vmem:[#allocation7 + $0x70] sm:$0xff] }
 0x1f3   :  { %1589 = vmatpush.bf16.msra.mxu3 %v2306_v15  ;;  %v1293_v15 = vld [vmem:[%s2702_s8] sm:$0x7] }
 0x1f4   :  { %v1204_v21 = vadd.f32 %v1203_v36, %v1190_v19  ;;  %v2314_v36 = vld [vmem:[#allocation7 + $0x78] sm:$0xff]  ;;  %v2304_v19 = vld [vmem:[#allocation7 + $0x28] sm:$0xff] }
 0x1f5   :  { %1603 = vmatpush.bf16.msra.mxu0 %v2314_v36  ;;  %1618 = vmatpush.bf16.msrb.mxu1 %v2321_v39  ;;  %v1375_v39 = vperm.slane %v1293_v15, 1 }
 0x1f6   :  { %v1218_v27 = vadd.f32 %v1217_v37, %v1204_v21  ;;  %v2305_v37 = vld [vmem:[#allocation7 + $0x30] sm:$0xff]  ;;  %v2319_v21 = vld [vmem:[#allocation7 + $0xa0] sm:$0xff] }
 0x1f7   :  { %v1177_v55 = vpop.f32.mrf.mxu3  ;;  %1590 = vmatpush.bf16.msra.mxu3 %v2305_v37 }
 0x1f8   :  { %v1219_v22 = vpop.f32.mrf.mxu2  ;;  %v1178_v23 = vadd.f32 %v1177_v55, %v311_v7  ;;  %v2646_v43 = vadd.f32 %v1281_v28, %v1218_v27  ;;  %v2320_v55 = vld [vmem:[#allocation7 + $0xa8] sm:$0xff] }
 0x1f9   :  { %1604 = vmatpush.bf16.msra.mxu0 %v2313_v61  ;;  %1619 = vmatpush.bf16.msrb.mxu1 %v2320_v55 }
 0x1fa   :  { %v1192_v29 = vadd.f32 %v1191_v40, %v1178_v23  ;;  %v1245_v32 = vpop.f32.mrf.mxu0  ;;  %v1303_v50 = vmul.f32 %v2646_v43, %v2646_v43  ;;  %v1294_v62 = vadd.f32 %v2646_v43, %v2648_v49  ;;  %v2312_v40 = vld [vmem:[#allocation7 + $0x68] sm:$0xff]  ;;  %v2310_v23 = vld [vmem:[#allocation7 + $0x58] sm:$0xff] }
 0x1fb   :  { %v1259_v44 = vpop.f32.mrf.mxu1  ;;  %1591 = vmatpush.bf16.msra.mxu3 %v2304_v19 }
 0x1fc   :  { %v1206_v45 = vadd.f32 %v1205_v20, %v1192_v29  ;;  %v1308_v63 = vadd.f32 %v1303_v50, %v1302_v57  ;;  %v2311_v20 = vld [vmem:[#allocation7 + $0x60] sm:$0xff]  ;;  %v2301_v29 = vld [vmem:[#allocation7 + $0x10] sm:$0xff] }
 0x1fd   :  { %1605 = vmatpush.bf16.msra.mxu0 %v2312_v40  ;;  %1620 = vmatpush.bf16.msrb.mxu1 %v2319_v21 }
 0x1fe   :  { %v1220_v54 = vadd.f32 %v1219_v22, %v1206_v45  ;;  %v2302_v22 = vld [vmem:[#allocation7 + $0x18] sm:$0xff] }
 0x1ff   :  { %1592 = vmatpush.bf16.msra.mxu3 %v2303_v58 }
 0x200   :  { %v1231_v33 = vpop.f32.mrf.mxu3  ;;  %v2658_v0 = vadd.f32 %v1281_v28, %v1220_v54  ;;  %v2315_v54 = vld [vmem:[#allocation7 + $0x80] sm:$0xff] }
 0x201   :  { %v1232_v42 = vadd.f32 %v1231_v33, %v323_v5  ;;  %v1273_v16 = vpop.f32.mrf.mxu2  ;;  %1606 = vmatpush.bf16.msra.mxu0 %v2311_v20  ;;  %1621 = vmatpush.bf16.msrb.mxu1 %v2318_v24 }
 0x202   :  { %v1247_v47 = vpop.f32.mrf.mxu0  ;;  %v1306_v9 = vmul.f32 %v2658_v0, %v2658_v0  ;;  %v1298_v11 = vadd.f32 %v2658_v0, %v2663_v4 }
 0x203   :  { %v1246_v48 = vadd.f32 %v1245_v32, %v1232_v42  ;;  %v1261_v46 = vpop.f32.mrf.mxu1  ;;  %1593 = vmatpush.bf16.msra.mxu3 %v2302_v22  ;;  %v2308_v42 = vld [vmem:[#allocation7 + $0x48] sm:$0xff] }
 0x204   :  { %v1312_v14 = vadd.f32 %v1306_v9, %v1305_v12 }
 0x205   :  { %v1260_v52 = vadd.f32 %v1259_v44, %v1246_v48  ;;  %1607 = vmatpush.bf16.msra.mxu0 %v2310_v23  ;;  %1622 = vmatpush.bf16.msrb.mxu1 %v2317_v31  ;;  %v2316_v44 = vld [vmem:[#allocation7 + $0x88] sm:$0xff] }
 0x207   :  { %v1274_v38 = vadd.f32 %v1273_v16, %v1260_v52  ;;  %1594 = vmatpush.bf16.msra.mxu3 %v2301_v29  ;;  %v2307_v52 = vld [vmem:[#allocation7 + $0x40] sm:$0xff] }
 0x208   :  { %v1233_v56 = vpop.f32.mrf.mxu3 }
 0x209   :  { %v2654_v18 = vadd.f32 %v1282_v53, %v1274_v38  ;;  %v1234_v60 = vadd.f32 %v1233_v56, %v325_v8  ;;  %v1275_v7 = vpop.f32.mrf.mxu2  ;;  %1608 = vmatpush.bf16.msra.mxu0 %v2309_v30  ;;  %1623 = vmatpush.bf16.msrb.mxu1 %v2316_v44 }
 0x20b   :  { %v1248_v1 = vadd.f32 %v1247_v47, %v1234_v60  ;;  %v1295_v2 = vadd.f32 %v1294_v62, %v2654_v18  ;;  %v1304_v3 = vmul.f32 %v2654_v18, %v2654_v18  ;;  %1595 = vmatpush.bf16.msra.mxu3 %v2300_v41 }
 0x20d   :  { %v1262_v5 = vadd.f32 %v1261_v46, %v1248_v1  ;;  %1296 = vadd.xlane.f32.xlu2 %v1295_v2  ;;  %v1309_v6 = vadd.f32 %v1308_v63, %v1304_v3  ;;  %1609 = vmatpush.bf16.msra.mxu0 %v2308_v42 }
 0x20e   :  { %1624 = vmatpush.bf16.msrb.mxu1 %v2315_v54  ;;  %v1444_v54 = vstv %s2704_s10 }
 0x20f   :  { %v1276_v8 = vadd.f32 %v1275_v7, %v1262_v5  ;;  %1310 = vadd.xlane.f32.xlu0 %v1309_v6  ;;  %1596 = vmatpush.bf16.msra.mxu3 %v2299_v51  ;;  %v1292_v6 = vld [vmem:[%s2701_s7] sm:$0x7] }
 0x210   :  { %v1362_v36 = vperm.slane %v1292_v6, 1  ;;  %v1363_v37 = vperm.slane %v1292_v6, 2 }
 0x211   :  { %v2667_v34 = vadd.f32 %v1282_v53, %v1276_v8  ;;  %1610 = vmatpush.bf16.msra.mxu0 %v2307_v52 }
 0x213   :  { %v1299_v13 = vadd.f32 %v1298_v11, %v2667_v34  ;;  %v1307_v10 = vmul.f32 %v2667_v34, %v2667_v34 }
 0x215   :  { %1300 = vadd.xlane.f32.xlu2 %v1299_v13  ;;  %v1313_v35 = vadd.f32 %v1312_v14, %v1307_v10  ;;  %v1361_v13 = vperm.slane %v1292_v6, 0 }
 0x217   :  { %1314 = vadd.xlane.f32.xlu1 %v1313_v35 }
 0x280   :  { %v1297_v25 = vpop.xlane.xlu2 %1296 }
 0x281   :  { %v1316_v26 = vmul.f32 0.0033333334, %v1297_v25 }
 0x282   :  { %v1311_v27 = vpop.xlane.xlu0 %1310 }
 0x283   :  { %v1318_v28 = vmul.f32 0.0033333334, %v1311_v27  ;;  %v1320_v32 = vmul.f32 %v1316_v26, %v1316_v26  ;;  %v1348_v7 = vsub.f32 %v2648_v49, %v1316_v26  ;;  %v1349_v8 = vsub.f32 %v2646_v43, %v1316_v26 }
 0x284   :  { %v1350_v12 = vsub.f32 %v2654_v18, %v1316_v26  ;;  %v1374_v49 = vperm.slane %v1293_v15, 0  ;;  %v1376_v43 = vperm.slane %v1293_v15, 2 }
 0x285   :  { %v1322_v33 = vsub.f32 %v1318_v28, %v1320_v32 }
 0x287   :  { %v1324_v45 = vmax.f32 %v1322_v33, 0.0 }
 0x288   :  { %v1301_v48 = vpop.xlane.xlu2 %1300 }
 0x289   :  { %v1317_v16 = vmul.f32 0.0033333334, %v1301_v48  ;;  %v1326_v53 = vadd.f32 1e-05, %v1324_v45 }
 0x28a   :  { %v1315_v50 = vpop.xlane.xlu1 %1314 }
 0x28b   :  { %v1319_v38 = vmul.f32 0.0033333334, %v1315_v50  ;;  %2341 = vrsqrt.f32 %v1326_v53  ;;  %v1321_v56 = vmul.f32 %v1317_v16, %v1317_v16  ;;  %vm1334_vm9 = vweird.f32 %v1326_v53 }
 0x28c   :  { %v1351_v55 = vsub.f32 %v2663_v4, %v1317_v16  ;;  %v1352_v58 = vsub.f32 %v2658_v0, %v1317_v16  ;;  %v1353_v20 = vsub.f32 %v2667_v34, %v1317_v16 }
 0x28d   :  { %v1323_v57 = vsub.f32 %v1319_v38, %v1321_v56 }
 0x28f   :  { %v1325_v17 = vmax.f32 %v1323_v57, 0.0 }
 0x291   :  { %v2342_v60 = vpop.eup %2341  ;;  %v1327_v62 = vadd.f32 1e-05, %v1325_v17 }
 0x292   :  { %v1329_v47 = vmul.f32 %v2342_v60, %v1326_v53  ;;  %vm1335_vm8 = vweird.f32 %v2342_v60 }
 0x293   :  { %2343 = vrsqrt.f32 %v1327_v62  ;;  %vm1336_vm10 = vmor %vm1334_vm9, %vm1335_vm8  ;;  %vm1344_vm12 = vweird.f32 %v1327_v62 }
 0x294   :  { %v1330_v63 = vmul.f32 %v2342_v60, %v1329_v47 }
 0x296   :  { %v1331_v1 = vmul.f32 0.5, %v1330_v63 }
 0x298   :  { %v1332_v2 = vsub.f32 1.5, %v1331_v1 }
 0x299   :  { %v2344_v3 = vpop.eup %2343 }
 0x29a   :  { %v1333_v46 = vmul.f32 %v2342_v60, %v1332_v2  ;;  %v1339_v5 = vmul.f32 %v2344_v3, %v1327_v62  ;;  %vm1345_vm11 = vweird.f32 %v2344_v3 }
 0x29b   :  { %vm1346_vm13 = vmor %vm1344_vm12, %vm1345_vm11 }
 0x29c   :  { %v1337_v9 = vsel %vm1336_vm10, %v2342_v60, %v1333_v46  ;;  %v1340_v11 = vmul.f32 %v2344_v3, %v1339_v5 }
 0x29d   :  { %v1354_v10 = vmul.f32 %v1348_v7, %v1337_v9  ;;  %v1355_v14 = vmul.f32 %v1349_v8, %v1337_v9  ;;  %v1356_v59 = vmul.f32 %v1350_v12, %v1337_v9 }
 0x29e   :  { %v1341_v35 = vmul.f32 0.5, %v1340_v11 }
 0x29f   :  { %v1367_v40 = vmul.f32 %v1361_v13, %v1354_v10  ;;  %v1368_v18 = vmul.f32 %v1362_v36, %v1355_v14  ;;  %v1369_v21 = vmul.f32 %v1363_v37, %v1356_v59 }
 0x2a0   :  { %v1342_v61 = vsub.f32 1.5, %v1341_v35 }
 0x2a1   :  { %v1380_v26 = vadd.f32 %v1374_v49, %v1367_v40  ;;  %v1381_v27 = vadd.f32 %v1375_v39, %v1368_v18  ;;  %v1382_v31 = vadd.f32 %v1376_v43, %v1369_v21 }
 0x2a2   :  { %v1343_v19 = vmul.f32 %v2344_v3, %v1342_v61 }
 0x2a3   :  { %v1386_v4 = vmax.f32 %v1380_v26, 0.0  ;;  %v1387_v42 = vmax.f32 %v1381_v27, 0.0  ;;  %v1388_v34 = vmax.f32 %v1382_v31, 0.0 }
 0x2a4   :  { %v1347_v22 = vsel %vm1346_vm13, %v2344_v3, %v1343_v19 }
 0x2a5   :  { %v1357_v23 = vmul.f32 %v1351_v55, %v1347_v22  ;;  %v1358_v24 = vmul.f32 %v1352_v58, %v1347_v22  ;;  %v1359_v25 = vmul.f32 %v1353_v20, %v1347_v22 }
 0x2a7   :  { %v1370_v28 = vmul.f32 %v1361_v13, %v1357_v23  ;;  %v1371_v29 = vmul.f32 %v1362_v36, %v1358_v24  ;;  %v1372_v30 = vmul.f32 %v1363_v37, %v1359_v25 }
 0x2a9   :  { %v1383_v32 = vadd.f32 %v1374_v49, %v1370_v28  ;;  %v1384_v33 = vadd.f32 %v1375_v39, %v1371_v29  ;;  %v1385_v41 = vadd.f32 %v1376_v43, %v1372_v30 }
 0x2ab   :  { %v1389_v0 = vmax.f32 %v1383_v32, 0.0  ;;  %v1390_v44 = vmax.f32 %v1384_v33, 0.0  ;;  %v1391_v45 = vmax.f32 %v1385_v41, 0.0 }
 0x2ad   :  { %v1392_v48 = vpack.c.bf16 %v1389_v0, %v1386_v4  ;;  %v1393_v16 = vpack.c.bf16 %v1390_v44, %v1387_v42  ;;  %v1394_v51 = vpack.c.bf16 %v1391_v45, %v1388_v34 }
 0x2af   :  { %1597 = vmatmul.bf16.vlgmr.msra.gmra.mxu3 %v1392_v48  ;;  %1611 = vmatmul.bf16.vlgmr.msra.gmra.mxu0 %v1393_v16 }
 0x2b0   :  { %1625 = vmatmul.bf16.vlgmr.msrb.gmra.mxu1 %v1394_v51 }
 0x32c   :  { %v1612_v52 = vpop.f32.mrf.mxu0 }
 0x32d   :  { %v1626_v50 = vpop.f32.mrf.mxu1 }
 0x332   :  { %v1598_v53 = vpop.f32.mrf.mxu3 }
 0x333   :  { %v1599_v38 = vadd.f32 %v1598_v53, %v1444_v54 }
 0x334   :  { %v1614_v60 = vpop.f32.mrf.mxu0 }
 0x335   :  { %v1613_v57 = vadd.f32 %v1612_v52, %v1599_v38  ;;  %v1628_v47 = vpop.f32.mrf.mxu1 }
 0x337   :  { %v1627_v63 = vadd.f32 %v1626_v50, %v1613_v57 }
 0x33a   :  { %v1600_v56 = vpop.f32.mrf.mxu3 }
 0x33b   :  { %v1601_v17 = vadd.f32 %v1600_v56, %v1444_v54 }
 0x33d   :  { %v1615_v62 = vadd.f32 %v1614_v60, %v1601_v17 }
 0x33f   :  { %v1629_v1 = vadd.f32 %v1628_v47, %v1615_v62 }
 0x341   :  { %v2326_v2 = vpack.c.bf16 %v1629_v1, %v1627_v63 }
 0x343   :  { %2327 = vst [vmem:[%s2705_s11] sm:$0xff] %v2326_v2  }
 0x344   :  { %1639 = vsyncpa [#allocation4], 1 }
 0x345   :  { %1640 = vsyncpa [#allocation6], 1 }

</bundles_post_ra>
